<compile_context>
chip_gen: v7x
topology: tpu7x:2x2x1
jax: 0.10.0
libtpu: 0.0.40
codegen_flags: <defaults>
</compile_context>

<pallas_src>
import functools

import jax
import jax.numpy as jnp
from jax.experimental import pallas as pl
from jax.experimental.pallas import tpu as pltpu

FEAT_DIM = 2048          # the module reshapes the backbone output to (B, 2048)
_VMEM_BUDGET = 40 << 20  # conservative across v5e/v6e (128 MiB) and v7x (64 MiB) VMEM


def _round_up(x, m):
    return (x + m - 1) // m * m


# ----------------------------------------------------------------------------
# Fused kernel
# ----------------------------------------------------------------------------
def _fused_kernel(x_ref, pw, wp, bp, w01, b01, w2, b2, w3, b3, o_ref):
    # Backbone stand-in: global average pool as an MXU contraction (1/(H*W) is folded
    # into pw), then a linear projection to 2048 features.
    pooled = jnp.dot(x_ref[...], pw[...], preferred_element_type=jnp.float32)     # (Bt, Cp) f32
    feat = jnp.dot(pooled.astype(jnp.bfloat16), wp[...],
                   preferred_element_type=jnp.float32) + bp[...]                  # (Bt, 2048) f32

    # MLP head.  The reference forward has NO activation between fc and fc1, so the
    # two Linears are folded offline into a single (2048, 256) matmul (w01 / b01).
    h = jnp.dot(feat.astype(jnp.bfloat16), w01[...],
                preferred_element_type=jnp.float32) + b01[...]                     # fc∘fc1 -> 256
    h = jnp.maximum(h, 0.0)                                                        # relu (f32)
    h = jnp.dot(h.astype(jnp.bfloat16), w2[...],
                preferred_element_type=jnp.float32) + b2[...]                      # fc2 -> 128
    h = jnp.maximum(h, 0.0)                                                        # relu (f32)
    h = jnp.dot(h.astype(jnp.bfloat16), w3[...],
                preferred_element_type=jnp.float32) + b3[...]                      # fc3 -> out_pad
    o_ref[...] = h                                                                 # lane-dense store


# ----------------------------------------------------------------------------
# Parameter construction (deterministic, in-script; f32 masters)
# ----------------------------------------------------------------------------
def init_params(key, input_channels, output_dim):
    def linear(k, fan_in, fan_out):
        kw, kb = jax.random.split(k)
        scale = 1.0 / jnp.sqrt(jnp.float32(fan_in))
        w = jax.random.uniform(kw, (fan_in, fan_out), jnp.float32, -scale, scale)
        b = jax.random.uniform(kb, (1, fan_out), jnp.float32, -scale, scale)
        return w, b

    keys = jax.random.split(key, 5)
    return {
        "proj": linear(keys[0], input_channels, FEAT_DIM),  # backbone stand-in
        "fc":   linear(keys[1], FEAT_DIM, 512),
        "fc1":  linear(keys[2], 512, 256),
        "fc2":  linear(keys[3], 256, 128),
        "fc3":  linear(keys[4], 128, output_dim),
    }


# ----------------------------------------------------------------------------
# Batch-tile selection (VMEM-aware, generation-agnostic)
# ----------------------------------------------------------------------------
def _pick_b_tile(B, per_row_bytes, resident_bytes):
    if B <= 32:
        return _round_up(B, 16)                      # bf16 packs 16 rows / sublane group
    avail = _VMEM_BUDGET - 2 * resident_bytes - (4 << 20)   # 2x: double-buffered residents
    t = min(256, max(16, avail // per_row_bytes))    # 256 fills a 256-wide MXU M dimension
    t = max(16, (t // 16) * 16)
    half = _round_up(-(-B // 2), 16)                 # keep >= 2 grid steps (v7x: 2 TCs)
    return min(t, half)


# ----------------------------------------------------------------------------
# Wrapper
# ----------------------------------------------------------------------------
@functools.partial(jax.jit, static_argnames=("output_dim",))
def efficient_network_forward(x_nchw, params, *, output_dim):
    B, C, H, W = x_nchw.shape
    HW = H * W
    CHW = C * HW
    c_pad = _round_up(C, 8)
    out_pad = _round_up(output_dim, 128)            # lane-dense output slab

    # ---- weight prep (static shapes; folded once under jit) ----------------
    wp, bp = params["proj"]
    w0, b0 = params["fc"]
    w1, b1 = params["fc1"]
    w2, b2 = params["fc2"]
    w3, b3 = params["fc3"]

    # Pooling matrix: entry [c*HW + h, c] = 1/HW (average-pool folded in).
    pool_w = (jnp.repeat(jnp.eye(C, c_pad, dtype=jnp.float32), HW, axis=0)
              * (1.0 / HW)).astype(jnp.bfloat16)                       # (C*HW, c_pad)
    wp_b = jnp.pad(wp, ((0, c_pad - C), (0, 0))).astype(jnp.bfloat16)  # (c_pad, 2048)

    # Fold fc into fc1 (algebraically identical: no nonlinearity between them).
    w01 = (w0 @ w1).astype(jnp.bfloat16)                               # (2048, 256)
    b01 = b0 @ w1 + b1                                                 # (1, 256) f32
    w2_b = w2.astype(jnp.bfloat16)
    w3_b = jnp.pad(w3, ((0, 0), (0, out_pad - output_dim))).astype(jnp.bfloat16)
    b3_p = jnp.pad(b3, ((0, 0), (0, out_pad - output_dim)))

    # ---- VMEM-aware batch tiling --------------------------------------------
    resident_bytes = (CHW * c_pad * 2 + c_pad * FEAT_DIM * 2 + FEAT_DIM * 4
                      + FEAT_DIM * 256 * 2 + 256 * 4
                      + 256 * 128 * 2 + 128 * 4
                      + 128 * out_pad * 2 + out_pad * 4)
    per_row_bytes = (2 * CHW * 2                         # double-buffered bf16 input block
                     + 2 * out_pad * 4                   # double-buffered f32 output block
                     + (c_pad + FEAT_DIM + 256 + 128 + out_pad) * 4)  # f32 activations
    b_tile = _pick_b_tile(B, per_row_bytes, resident_bytes)
    b_pad = _round_up(B, b_tile)
    grid = (b_pad // b_tile,)
    # TODO(synk): for very large C*HW (real 224x224 images) add a second "arbitrary"
    # grid axis over HW with a pooled-sum accumulator instead of one (b_tile, C*HW) slab.

    # ---- input prep: bf16 (halves the only per-step HBM stream), lane-dense 2-D ----
    x = x_nchw.reshape(B, CHW).astype(jnp.bfloat16)
    if b_pad != B:
        x = jnp.pad(x, ((0, b_pad - B), (0, 0)))

    need = 2 * resident_bytes + b_tile * per_row_bytes + (4 << 20)
    vmem_limit = int(min(_round_up(need, 1 << 20), 48 << 20)) if need > (16 << 20) else None

    flops = 2 * b_pad * (CHW * c_pad + c_pad * FEAT_DIM + FEAT_DIM * 256
                         + 256 * 128 + 128 * out_pad)
    bytes_accessed = b_pad * CHW * 2 + resident_bytes + b_pad * out_pad * 4

    def resident(arr):
        # Constant block index -> stays VMEM-resident across all grid steps.
        # TODO(synk): pipeline_mode=pl.Buffered(1) would drop the second buffer
        # (~1 MiB); left at the default for conservative compilation.
        return pl.BlockSpec(arr.shape, lambda i: (0, 0))

    out = pl.pallas_call(
        _fused_kernel,
        out_shape=jax.ShapeDtypeStruct((b_pad, out_pad), jnp.float32),
        grid=grid,
        in_specs=[
            pl.BlockSpec((b_tile, CHW), lambda i: (i, 0)),
            resident(pool_w), resident(wp_b), resident(bp),
            resident(w01), resident(b01),
            resident(w2_b), resident(b2),
            resident(w3_b), resident(b3_p),
        ],
        out_specs=pl.BlockSpec((b_tile, out_pad), lambda i: (i, 0)),
        compiler_params=pltpu.CompilerParams(
            dimension_semantics=("parallel",),
            vmem_limit_bytes=vmem_limit,
        ),
        cost_estimate=pl.CostEstimate(flops=flops, transcendentals=0,
                                      bytes_accessed=bytes_accessed),
    )(x, pool_w, wp_b, bp, w01, b01, w2_b, b2, w3_b, b3_p)

    return out[:B, :output_dim]


if __name__ == "__main__":
    # Small shapes consistent with the module's forward contract.
    B, C, H, W = 2, 4, 16, 16
    OUTPUT_DIM = 8

    key = jax.random.PRNGKey(0)
    k_x, k_p = jax.random.split(key)
    x = jax.random.normal(k_x, (B, C, H, W), jnp.float32)
    params = init_params(k_p, C, OUTPUT_DIM)

    out = efficient_network_forward(x, params, output_dim=OUTPUT_DIM)
    jax.block_until_ready(out)
    assert out.shape == (B, OUTPUT_DIM), out.shape
    print("KERNEL_OK")
</pallas_src>

<mosaic_0001>
module attributes {stable_mosaic.version = 11 : i64} {
  func.func @_fused_kernel(%arg0: i32, %arg1: memref<16x1024xbf16, #tpu.memory_space<vmem>>, %arg2: memref<1024x8xbf16, #tpu.memory_space<vmem>>, %arg3: memref<8x2048xbf16, #tpu.memory_space<vmem>>, %arg4: memref<1x2048xf32, #tpu.memory_space<vmem>>, %arg5: memref<2048x256xbf16, #tpu.memory_space<vmem>>, %arg6: memref<1x256xf32, #tpu.memory_space<vmem>>, %arg7: memref<256x128xbf16, #tpu.memory_space<vmem>>, %arg8: memref<1x128xf32, #tpu.memory_space<vmem>>, %arg9: memref<128x128xbf16, #tpu.memory_space<vmem>>, %arg10: memref<1x128xf32, #tpu.memory_space<vmem>>, %arg11: memref<16x128xf32, #tpu.memory_space<vmem>>) attributes {dimension_semantics = [#tpu.dimension_semantics<parallel>], iteration_bounds = array<i64: 1>, scalar_prefetch = 0 : i64, scratch_operands = 0 : i64, tpu.core_type = #tpu.core_type<tc>, window_params = [{transform_indices = @transform_0, window_bounds = array<i64: 16, 1024>}, {pipeline_mode = #tpu.pipeline_mode<synchronous>, transform_indices = @transform_1, window_bounds = array<i64: 1024, 8>}, {pipeline_mode = #tpu.pipeline_mode<synchronous>, transform_indices = @transform_2, window_bounds = array<i64: 8, 2048>}, {pipeline_mode = #tpu.pipeline_mode<synchronous>, transform_indices = @transform_3, window_bounds = array<i64: 1, 2048>}, {pipeline_mode = #tpu.pipeline_mode<synchronous>, transform_indices = @transform_4, window_bounds = array<i64: 2048, 256>}, {pipeline_mode = #tpu.pipeline_mode<synchronous>, transform_indices = @transform_5, window_bounds = array<i64: 1, 256>}, {pipeline_mode = #tpu.pipeline_mode<synchronous>, transform_indices = @transform_6, window_bounds = array<i64: 256, 128>}, {pipeline_mode = #tpu.pipeline_mode<synchronous>, transform_indices = @transform_7, window_bounds = array<i64: 1, 128>}, {pipeline_mode = #tpu.pipeline_mode<synchronous>, transform_indices = @transform_8, window_bounds = array<i64: 128, 128>}, {pipeline_mode = #tpu.pipeline_mode<synchronous>, transform_indices = @transform_9, window_bounds = array<i64: 1, 128>}, {transform_indices = @transform_10, window_bounds = array<i64: 16, 128>}]} {
    %c0 = arith.constant 0 : index
    %c0_0 = arith.constant 0 : index
    %0 = vector.load %arg1[%c0, %c0_0] : memref<16x1024xbf16, #tpu.memory_space<vmem>>, vector<16x1024xbf16>
    %c0_1 = arith.constant 0 : index
    %c0_2 = arith.constant 0 : index
    %1 = vector.load %arg2[%c0_1, %c0_2] : memref<1024x8xbf16, #tpu.memory_space<vmem>>, vector<1024x8xbf16>
    %cst = arith.constant dense<0.000000e+00> : vector<16x8xf32>
    %2 = tpu.matmul %0, %1, %cst {dimension_numbers = #tpu.dot_dimension_numbers<[1], [0], [0], [1], [0, 0, 1, 1], [], []>} : vector<16x1024xbf16>, vector<1024x8xbf16>, vector<16x8xf32> -> vector<16x8xf32>
    %3 = arith.truncf %2 : vector<16x8xf32> to vector<16x8xbf16>
    %c0_3 = arith.constant 0 : index
    %c0_4 = arith.constant 0 : index
    %4 = vector.load %arg3[%c0_3, %c0_4] : memref<8x2048xbf16, #tpu.memory_space<vmem>>, vector<8x2048xbf16>
    %cst_5 = arith.constant dense<0.000000e+00> : vector<16x2048xf32>
    %5 = tpu.matmul %3, %4, %cst_5 {dimension_numbers = #tpu.dot_dimension_numbers<[1], [0], [0], [1], [0, 0, 1, 1], [], []>} : vector<16x8xbf16>, vector<8x2048xbf16>, vector<16x2048xf32> -> vector<16x2048xf32>
    %c0_6 = arith.constant 0 : index
    %c0_7 = arith.constant 0 : index
    %6 = vector.load %arg4[%c0_6, %c0_7] : memref<1x2048xf32, #tpu.memory_space<vmem>>, vector<1x2048xf32>
    %7 = vector.broadcast %6 : vector<1x2048xf32> to vector<16x2048xf32>
    %8 = arith.addf %5, %7 : vector<16x2048xf32>
    %9 = arith.truncf %8 : vector<16x2048xf32> to vector<16x2048xbf16>
    %c0_8 = arith.constant 0 : index
    %c0_9 = arith.constant 0 : index
    %10 = vector.load %arg5[%c0_8, %c0_9] : memref<2048x256xbf16, #tpu.memory_space<vmem>>, vector<2048x256xbf16>
    %cst_10 = arith.constant dense<0.000000e+00> : vector<16x256xf32>
    %11 = tpu.matmul %9, %10, %cst_10 {dimension_numbers = #tpu.dot_dimension_numbers<[1], [0], [0], [1], [0, 0, 1, 1], [], []>} : vector<16x2048xbf16>, vector<2048x256xbf16>, vector<16x256xf32> -> vector<16x256xf32>
    %c0_11 = arith.constant 0 : index
    %c0_12 = arith.constant 0 : index
    %12 = vector.load %arg6[%c0_11, %c0_12] : memref<1x256xf32, #tpu.memory_space<vmem>>, vector<1x256xf32>
    %13 = vector.broadcast %12 : vector<1x256xf32> to vector<16x256xf32>
    %14 = arith.addf %11, %13 : vector<16x256xf32>
    %cst_13 = arith.constant 0.000000e+00 : f32
    %15 = vector.broadcast %cst_13 : f32 to vector<16x256xf32>
    %16 = arith.maximumf %14, %15 : vector<16x256xf32>
    %17 = arith.truncf %16 : vector<16x256xf32> to vector<16x256xbf16>
    %c0_14 = arith.constant 0 : index
    %c0_15 = arith.constant 0 : index
    %18 = vector.load %arg7[%c0_14, %c0_15] : memref<256x128xbf16, #tpu.memory_space<vmem>>, vector<256x128xbf16>
    %cst_16 = arith.constant dense<0.000000e+00> : vector<16x128xf32>
    %19 = tpu.matmul %17, %18, %cst_16 {dimension_numbers = #tpu.dot_dimension_numbers<[1], [0], [0], [1], [0, 0, 1, 1], [], []>} : vector<16x256xbf16>, vector<256x128xbf16>, vector<16x128xf32> -> vector<16x128xf32>
    %c0_17 = arith.constant 0 : index
    %c0_18 = arith.constant 0 : index
    %20 = vector.load %arg8[%c0_17, %c0_18] : memref<1x128xf32, #tpu.memory_space<vmem>>, vector<1x128xf32>
    %21 = vector.broadcast %20 : vector<1x128xf32> to vector<16x128xf32>
    %22 = arith.addf %19, %21 : vector<16x128xf32>
    %cst_19 = arith.constant 0.000000e+00 : f32
    %23 = vector.broadcast %cst_19 : f32 to vector<16x128xf32>
    %24 = arith.maximumf %22, %23 : vector<16x128xf32>
    %25 = arith.truncf %24 : vector<16x128xf32> to vector<16x128xbf16>
    %c0_20 = arith.constant 0 : index
    %c0_21 = arith.constant 0 : index
    %26 = vector.load %arg9[%c0_20, %c0_21] : memref<128x128xbf16, #tpu.memory_space<vmem>>, vector<128x128xbf16>
    %cst_22 = arith.constant dense<0.000000e+00> : vector<16x128xf32>
    %27 = tpu.matmul %25, %26, %cst_22 {dimension_numbers = #tpu.dot_dimension_numbers<[1], [0], [0], [1], [0, 0, 1, 1], [], []>} : vector<16x128xbf16>, vector<128x128xbf16>, vector<16x128xf32> -> vector<16x128xf32>
    %c0_23 = arith.constant 0 : index
    %c0_24 = arith.constant 0 : index
    %28 = vector.load %arg10[%c0_23, %c0_24] : memref<1x128xf32, #tpu.memory_space<vmem>>, vector<1x128xf32>
    %29 = vector.broadcast %28 : vector<1x128xf32> to vector<16x128xf32>
    %30 = arith.addf %27, %29 : vector<16x128xf32>
    %c0_25 = arith.constant 0 : index
    %c0_26 = arith.constant 0 : index
    %31 = vector.load %arg11[%c0_25, %c0_26] : memref<16x128xf32, #tpu.memory_space<vmem>>, vector<16x128xf32>
    tpu.vector_store %arg11[%c0_25, %c0_26], %30 {strides = array<i32>} : memref<16x128xf32, #tpu.memory_space<vmem>>, vector<16x128xf32>,
    return
  }
  func.func @transform_0(%arg0: i32) -> (i32, i32) {
    %c0_i32 = arith.constant 0 : i32
    %c0_i32_0 = arith.constant 0 : i32
    return %arg0, %c0_i32 : i32, i32
  }
  func.func @transform_1(%arg0: i32) -> (i32, i32) {
    %c0_i32 = arith.constant 0 : i32
    %c0_i32_0 = arith.constant 0 : i32
    %c0_i32_1 = arith.constant 0 : i32
    return %c0_i32, %c0_i32_0 : i32, i32
  }
  func.func @transform_2(%arg0: i32) -> (i32, i32) {
    %c0_i32 = arith.constant 0 : i32
    %c0_i32_0 = arith.constant 0 : i32
    %c0_i32_1 = arith.constant 0 : i32
    return %c0_i32, %c0_i32_0 : i32, i32
  }
  func.func @transform_3(%arg0: i32) -> (i32, i32) {
    %c0_i32 = arith.constant 0 : i32
    %c0_i32_0 = arith.constant 0 : i32
    %c0_i32_1 = arith.constant 0 : i32
    return %c0_i32, %c0_i32_0 : i32, i32
  }
  func.func @transform_4(%arg0: i32) -> (i32, i32) {
    %c0_i32 = arith.constant 0 : i32
    %c0_i32_0 = arith.constant 0 : i32
    %c0_i32_1 = arith.constant 0 : i32
    return %c0_i32, %c0_i32_0 : i32, i32
  }
  func.func @transform_5(%arg0: i32) -> (i32, i32) {
    %c0_i32 = arith.constant 0 : i32
    %c0_i32_0 = arith.constant 0 : i32
    %c0_i32_1 = arith.constant 0 : i32
    return %c0_i32, %c0_i32_0 : i32, i32
  }
  func.func @transform_6(%arg0: i32) -> (i32, i32) {
    %c0_i32 = arith.constant 0 : i32
    %c0_i32_0 = arith.constant 0 : i32
    %c0_i32_1 = arith.constant 0 : i32
    return %c0_i32, %c0_i32_0 : i32, i32
  }
  func.func @transform_7(%arg0: i32) -> (i32, i32) {
    %c0_i32 = arith.constant 0 : i32
    %c0_i32_0 = arith.constant 0 : i32
    %c0_i32_1 = arith.constant 0 : i32
    return %c0_i32, %c0_i32_0 : i32, i32
  }
  func.func @transform_8(%arg0: i32) -> (i32, i32) {
    %c0_i32 = arith.constant 0 : i32
    %c0_i32_0 = arith.constant 0 : i32
    %c0_i32_1 = arith.constant 0 : i32
    return %c0_i32, %c0_i32_0 : i32, i32
  }
  func.func @transform_9(%arg0: i32) -> (i32, i32) {
    %c0_i32 = arith.constant 0 : i32
    %c0_i32_0 = arith.constant 0 : i32
    %c0_i32_1 = arith.constant 0 : i32
    return %c0_i32, %c0_i32_0 : i32, i32
  }
  func.func @transform_10(%arg0: i32) -> (i32, i32) {
    %c0_i32 = arith.constant 0 : i32
    %c0_i32_0 = arith.constant 0 : i32
    return %arg0, %c0_i32 : i32, i32
  }
}

</mosaic_0001>

<bundles_post_ra>
// kernel: efficient_network_forward.1
= control target key start
LH: loop header
LB: loop body
LE: loop exit
PB: predicated region body
PF: predicated region fallthrough
CT: control target
= control target key end

     0   :  { %vm897_vm0 = vcmask 1043456   ;;  %vm893_vm1 = vcmask 64512   ;;  %vm4551_vm2 = vmmov 0   ;;  %s5880_s1 = inlined_call_operand.vmem [shape: bf16[1024,8], index: 1, kind: input, shape index: {}]   ;;  %s5881_s0 = inlined_call_operand.vmem [shape: bf16[16,1024], index: 0, kind: input, shape index: {}]   ;;  %s5882_s2 = inlined_call_operand.vmem [shape: bf16[8,2048], index: 2, kind: input, shape index: {}]   ;;  %s5883_s4 = inlined_call_operand.vmem [shape: bf16[2048,256], index: 4, kind: input, shape index: {}]   ;;  %s5884_s3 = inlined_call_operand.vmem [shape: f32[1,2048], index: 3, kind: input, shape index: {}]   ;;  %s5885_s6 = inlined_call_operand.vmem [shape: bf16[256,128], index: 6, kind: input, shape index: {}]   ;;  %s5886_s8 = inlined_call_operand.vmem [shape: bf16[128,128], index: 8, kind: input, shape index: {}]   ;;  %s5887_s5 = inlined_call_operand.vmem [shape: f32[1,256], index: 5, kind: input, shape index: {}]   ;;  %s5888_s7 = inlined_call_operand.vmem [shape: f32[1,128], index: 7, kind: input, shape index: {}]   ;;  %s5889_s9 = inlined_call_operand.vmem [shape: f32[1,128], index: 9, kind: input, shape index: {}]   ;;  %s5890_s10 = inlined_call_operand.vmem [shape: f32[16,128], index: 10, kind: output, shape index: {}]  }
   0x1   :  { %v4061_v0 = vld [vmem:[%s5880_s1 + $0x40] sm:$0xff]   ;;  %v4063_v2 = vld [vmem:[%s5880_s1 + $0x48] sm:$0xff]   ;;  %v4065_v4 = vld [vmem:[%s5880_s1 + $0x50] sm:$0xff]  }
   0x2   :  { %v4062_v1 = vld [vmem:[%s5880_s1] sm:$0xff]   ;;  %3887 = vmatprep.subr.bf16.mxu1 %v4061_v0  ;;  %v4064_v3 = vld [vmem:[%s5880_s1 + $0x8] sm:$0xff]   ;;  %v4066_v5 = vld [vmem:[%s5880_s1 + $0x10] sm:$0xff]  }
   0x3   :  { %3888 = vmatpush3.bf16.msra.mxu1 %v4062_v1  ;;  %v4067_v6 = vld [vmem:[%s5880_s1 + $0x58] sm:$0xff]   ;;  %v4069_v8 = vld [vmem:[%s5880_s1 + $0x60] sm:$0xff]   ;;  %v4071_v10 = vld [vmem:[%s5880_s1 + $0x68] sm:$0xff]  }
   0x4   :  { %3889 = vmatprep.subr.bf16.mxu1 %v4063_v2  ;;  %v4068_v7 = vld [vmem:[%s5880_s1 + $0x18] sm:$0xff]   ;;  %v4070_v9 = vld [vmem:[%s5880_s1 + $0x20] sm:$0xff]   ;;  %v4072_v13 = vld [vmem:[%s5880_s1 + $0x28] sm:$0xff]  }
   0x5   :  { %v36_v11 = vld [vmem:[%s5881_s0] sm:$0xff]  ;;  %v4073_v15 = vld [vmem:[%s5880_s1 + $0x70] sm:$0xff]   ;;  %v4075_v19 = vld [vmem:[%s5880_s1 + $0x78] sm:$0xff]  }
   0x6   :  { %v40_v12 = vld [vmem:[%s5881_s0 + $0x20] sm:$0xff]  ;;  %v4074_v18 = vld [vmem:[%s5880_s1 + $0x30] sm:$0xff]   ;;  %v4083_v20 = vld [vmem:[%s5880_s1 + $0x148] sm:$0xff]  }
   0x7   :  { %3890 = vmatpush3.bf16.msra.mxu1 %v4064_v3  ;;  %v3502_v14 = vcombine.high %v36_v11, %v40_v12  ;;  %v4079_v16 = vld [vmem:[%s5880_s1 + $0x140] sm:$0xff]   ;;  %v4084_v21 = vld [vmem:[%s5880_s1 + $0x108] sm:$0xff]   ;;  %v4076_v22 = vld [vmem:[%s5880_s1 + $0x38] sm:$0xff]   ;;  %v3501_v27 = vcombine.low %v36_v11, %v40_v12 }
   0x8   :  { %3891 = vmatprep.subr.bf16.mxu1 %v4065_v4  ;;  %v4080_v17 = vld [vmem:[%s5880_s1 + $0x100] sm:$0xff]   ;;  %3931 = vmatprep.subr.bf16.mxu0 %v4079_v16  ;;  %v4087_v24 = vld [vmem:[%s5880_s1 + $0x150] sm:$0xff]   ;;  %v4081_v28 = vld [vmem:[%s5880_s1 + $0xc8] sm:$0xff]  }
   0x9   :  { %628 = vmatprep.mubr.bf16.mxu1 %v3502_v14  ;;  %3932 = vmatpush3.bf16.msra.mxu0 %v4080_v17  ;;  %v4077_v23 = vld [vmem:[%s5880_s1 + $0xc0] sm:$0xff]   ;;  %v4088_v25 = vld [vmem:[%s5880_s1 + $0x110] sm:$0xff]   ;;  %v4091_v29 = vld [vmem:[%s5880_s1 + $0x158] sm:$0xff]  }
   0xa   :  { %3933 = vmatprep.subr.bf16.mxu0 %v4083_v20  ;;  %v4078_v26 = vld [vmem:[%s5880_s1 + $0x80] sm:$0xff]   ;;  %v4092_v30 = vld [vmem:[%s5880_s1 + $0x118] sm:$0xff]   ;;  %v4082_v31 = vld [vmem:[%s5880_s1 + $0x88] sm:$0xff]  }
   0xb   :  { %3892 = vmatpush3.bf16.msra.mxu1 %v4066_v5  ;;  %v4085_v32 = vld [vmem:[%s5880_s1 + $0xd0] sm:$0xff]   ;;  %v4095_v33 = vld [vmem:[%s5880_s1 + $0x160] sm:$0xff]   ;;  %v4089_v36 = vld [vmem:[%s5880_s1 + $0xd8] sm:$0xff]  }
   0xc   :  { %3893 = vmatprep.subr.bf16.mxu1 %v4067_v6  ;;  %v4096_v34 = vld [vmem:[%s5880_s1 + $0x120] sm:$0xff]   ;;  %v4086_v35 = vld [vmem:[%s5880_s1 + $0x90] sm:$0xff]   ;;  %v4099_v37 = vld [vmem:[%s5880_s1 + $0x168] sm:$0xff]  }
   0xd   :  { %3934 = vmatpush3.bf16.msra.mxu0 %v4084_v21  ;;  %v4100_v38 = vld [vmem:[%s5880_s1 + $0x128] sm:$0xff]   ;;  %v4090_v39 = vld [vmem:[%s5880_s1 + $0x98] sm:$0xff]   ;;  %v4093_v40 = vld [vmem:[%s5880_s1 + $0xe0] sm:$0xff]  }
   0xe   :  { %3935 = vmatprep.subr.bf16.mxu0 %v4087_v24  ;;  %v4103_v41 = vld [vmem:[%s5880_s1 + $0x170] sm:$0xff]   ;;  %v4094_v43 = vld [vmem:[%s5880_s1 + $0xa0] sm:$0xff]   ;;  %v4097_v44 = vld [vmem:[%s5880_s1 + $0xe8] sm:$0xff]  }
   0xf   :  { %3894 = vmatpush3.bf16.msra.mxu1 %v4068_v7  ;;  %v4104_v42 = vld [vmem:[%s5880_s1 + $0x130] sm:$0xff]   ;;  %v4107_v45 = vld [vmem:[%s5880_s1 + $0x178] sm:$0xff]   ;;  %v37_v46 = vld [vmem:[%s5881_s0 + $0x8] sm:$0xff] }
  0x10   :  { %3895 = vmatprep.subr.bf16.mxu1 %v4069_v8  ;;  %v41_v47 = vld [vmem:[%s5881_s0 + $0x28] sm:$0xff]  ;;  %v4108_v49 = vld [vmem:[%s5880_s1 + $0x138] sm:$0xff]   ;;  %v38_v50 = vld [vmem:[%s5881_s0 + $0x10] sm:$0xff] }
  0x11   :  { %3936 = vmatpush3.bf16.msra.mxu0 %v4088_v25  ;;  %v3504_v48 = vcombine.high %v37_v46, %v41_v47  ;;  %v42_v51 = vld [vmem:[%s5881_s0 + $0x30] sm:$0xff]  ;;  %v4098_v52 = vld [vmem:[%s5880_s1 + $0xa8] sm:$0xff]   ;;  %v4105_v57 = vld [vmem:[%s5880_s1 + $0xf8] sm:$0xff]   ;;  %v3503_v60 = vcombine.low %v37_v46, %v41_v47  ;;  %v4549_v25 = vmov 0  }
  0x12   :  { %3937 = vmatprep.subr.bf16.mxu0 %v4091_v29  ;;  %v3505_v53 = vcombine.low %v38_v50, %v42_v51  ;;  %v3506_v54 = vcombine.high %v38_v50, %v42_v51  ;;  %v4101_v55 = vld [vmem:[%s5880_s1 + $0xf0] sm:$0xff]   ;;  %v4106_v58 = vld [vmem:[%s5880_s1 + $0xb8] sm:$0xff]   ;;  %v4109_v59 = vld [vmem:[%s5880_s1 + $0x1c0] sm:$0xff]  }
  0x13   :  { %3896 = vmatpush3.bf16.msra.mxu1 %v4070_v9  ;;  %v4102_v56 = vld [vmem:[%s5880_s1 + $0xb0] sm:$0xff]   ;;  %v4110_v61 = vld [vmem:[%s5880_s1 + $0x180] sm:$0xff]   ;;  %v4111_v62 = vld [vmem:[%s5880_s1 + $0x1c8] sm:$0xff]  }
  0x14   :  { %3897 = vmatprep.subr.bf16.mxu1 %v4071_v10  ;;  %710 = vmatprep.mubr.bf16.mxu0 %v3506_v54  ;;  %v39_v63 = vld [vmem:[%s5881_s0 + $0x18] sm:$0xff]  ;;  %v4112_v1 = vld [vmem:[%s5880_s1 + $0x188] sm:$0xff]   ;;  %v4113_v3 = vld [vmem:[%s5880_s1 + $0x1d0] sm:$0xff]  }
  0x15   :  { %3938 = vmatpush3.bf16.msra.mxu0 %v4092_v30  ;;  %v43_v0 = vld [vmem:[%s5881_s0 + $0x38] sm:$0xff]  ;;  %v4114_v4 = vld [vmem:[%s5880_s1 + $0x190] sm:$0xff]   ;;  %v4117_v7 = vld [vmem:[%s5880_s1 + $0x1e0] sm:$0xff]  }
  0x16   :  { %3939 = vmatprep.subr.bf16.mxu0 %v4095_v33  ;;  %v3508_v2 = vcombine.high %v39_v63, %v43_v0  ;;  %v4115_v5 = vld [vmem:[%s5880_s1 + $0x1d8] sm:$0xff]   ;;  %v4118_v8 = vld [vmem:[%s5880_s1 + $0x1a0] sm:$0xff]   ;;  %v4119_v9 = vld [vmem:[%s5880_s1 + $0x1e8] sm:$0xff]  }
  0x17   :  { %3898 = vmatpush3.bf16.msra.mxu1 %v4072_v13  ;;  %v4116_v6 = vld [vmem:[%s5880_s1 + $0x198] sm:$0xff]   ;;  %v4120_v10 = vld [vmem:[%s5880_s1 + $0x1a8] sm:$0xff]   ;;  %v4121_v11 = vld [vmem:[%s5880_s1 + $0x1f0] sm:$0xff]  }
  0x18   :  { %3899 = vmatprep.subr.bf16.mxu1 %v4073_v15  ;;  %v4122_v12 = vld [vmem:[%s5880_s1 + $0x1b0] sm:$0xff]   ;;  %v4123_v13 = vld [vmem:[%s5880_s1 + $0x1f8] sm:$0xff]   ;;  %v3507_v15 = vcombine.low %v39_v63, %v43_v0  ;;  %v762_v16 = vld [vmem:[%s5882_s2 + $0x8] sm:$0xff] }
  0x19   :  { %3940 = vmatpush3.bf16.msra.mxu0 %v4096_v34  ;;  %v4124_v14 = vld [vmem:[%s5880_s1 + $0x1b8] sm:$0xff]   ;;  %v761_v17 = vld [vmem:[%s5882_s2] sm:$0xff] }
  0x1a   :  { %3941 = vmatprep.subr.bf16.mxu0 %v4099_v37  ;;  %v3574_v20 = vcombine.high %v761_v17, %v761_v17  ;;  %v3573_v21 = vcombine.low %v761_v17, %v761_v17  ;;  %v764_v24 = vld [vmem:[%s5882_s2 + $0x18] sm:$0xff]  ;;  %v4152_v17 = vld [vmem:[%s5883_s4 + $0x304] ss:$8 sps:$4 sm:$0xff]  }
  0x1b   :  { %3900 = vmatpush3.bf16.msra.mxu1 %v4074_v18  ;;  %v3576_v18 = vcombine.high %v762_v16, %v762_v16 }
  0x1c   :  { %3901 = vmatprep.subr.bf16.mxu1 %v4075_v19  ;;  %v3575_v19 = vcombine.low %v762_v16, %v762_v16  ;;  %v4143_v16 = vld [vmem:[%s5883_s4 + $0x4] ss:$8 sps:$4 sm:$0xff]  }
  0x1d   :  { %3942 = vmatpush3.bf16.msra.mxu0 %v4100_v38 }
  0x1e   :  { %3943 = vmatprep.subr.bf16.mxu0 %v4103_v41 }
  0x1f   :  { %3902 = vmatpush3.bf16.msra.mxu1 %v4076_v22  ;;  %v905_v22 = vsel %vm897_vm0, %v3575_v19, 0  ;;  %v4150_v19 = vld [vmem:[%s5883_s4 + $0x300] ss:$8 sps:$4 sm:$0xff]  }
  0x20   :  { %3909 = vmatprep.subr.bf16.mxu1 %v4077_v23  ;;  %v899_v23 = vsel %vm897_vm0, %v3573_v21, 0  ;;  %v4158_v21 = vld [vmem:[%s5883_s4 + $0x314] ss:$8 sps:$4 sm:$0xff]  }
  0x21   :  { %3944 = vmatpush3.bf16.msra.mxu0 %v4104_v42 }
  0x22   :  { %629 = vmatmul.mubr.bf16.vlgmr.msra.gmra.mrb[0].mxu1 %v3501_v27  ;;  %3945 = vmatprep.subr.bf16.mxu0 %v4107_v45  ;;  %v763_v27 = vld [vmem:[%s5882_s2 + $0x10] sm:$0xff] }
  0x23   :  { %3910 = vmatpush3.bf16.msra.mxu1 %v4078_v26  ;;  %669 = vmatprep.mubr.bf16.mxu1 %v3504_v48  ;;  %v3580_v26 = vcombine.high %v764_v24, %v764_v24 }
  0x24   :  { %3911 = vmatprep.subr.bf16.mxu1 %v4081_v28  ;;  %v3578_v28 = vcombine.high %v763_v27, %v763_v27 }
  0x25   :  { %3946 = vmatpush3.bf16.msra.mxu0 %v4108_v49 }
  0x26   :  { %3589 = vmatprep.subr.msk.bf16.mxu0 %vm897_vm0, %v3574_v20  ;;  %v4146_v20 = vld [vmem:[%s5883_s4 + $0x14] ss:$8 sps:$4 sm:$0xff]  }
  0x27   :  { %3912 = vmatpush3.bf16.msra.mxu1 %v4082_v31 }
  0x28   :  { %3913 = vmatprep.subr.bf16.mxu1 %v4085_v32  ;;  %711 = vmatmul.mubr.bf16.vlgmr.msra.gmra.mrb[0].mxu0 %v3505_v53 }
  0x29   :  { %947 = vmatpush1.bf16.msra.mxu0 %v899_v23  ;;  %978 = vmatprep.mubr.bf16.mxu0 %v4549_v25  ;;  %v4156_v23 = vld [vmem:[%s5883_s4 + $0x310] ss:$8 sps:$4 sm:$0xff]  }
  0x2a   :  { %3593 = vmatprep.subr.msk.bf16.mxu0 %vm897_vm0, %v3578_v28  ;;  %v4155_v28 = vld [vmem:[%s5883_s4 + $0x34] ss:$8 sps:$4 sm:$0xff]  }
  0x2b   :  { %3914 = vmatpush3.bf16.msra.mxu1 %v4086_v35 }
  0x2c   :  { %3915 = vmatprep.subr.bf16.mxu1 %v4089_v36 }
  0x2f   :  { %3916 = vmatpush3.bf16.msra.mxu1 %v4090_v39 }
  0x30   :  { %3917 = vmatprep.subr.bf16.mxu1 %v4093_v40 }
  0x33   :  { %3918 = vmatpush3.bf16.msra.mxu1 %v4094_v43 }
  0x34   :  { %3919 = vmatprep.subr.bf16.mxu1 %v4097_v44 }
  0x37   :  { %3920 = vmatpush3.bf16.msra.mxu1 %v4098_v52 }
  0x38   :  { %3921 = vmatprep.subr.bf16.mxu1 %v4101_v55 }
  0x3b   :  { %3922 = vmatpush3.bf16.msra.mxu1 %v4102_v56 }
  0x3c   :  { %3923 = vmatprep.subr.bf16.mxu1 %v4105_v57 }
  0x3f   :  { %3924 = vmatpush3.bf16.msra.mxu1 %v4106_v58  ;;  %v3579_v58 = vcombine.low %v764_v24, %v764_v24  ;;  %v4149_v24 = vld [vmem:[%s5883_s4 + $0x24] ss:$8 sps:$4 sm:$0xff]  }
  0x40   :  { %3953 = vmatprep.subr.bf16.mxu1 %v4109_v59  ;;  %v3577_v59 = vcombine.low %v763_v27, %v763_v27  ;;  %v4162_v27 = vld [vmem:[%s5883_s4 + $0x320] ss:$8 sps:$4 sm:$0xff]  }
  0x41   :  { %v917_v0 = vsel %vm897_vm0, %v3579_v58, 0  ;;  %v4195_v58 = vld [vmem:[%s5883_s4 + $0xa0] ss:$8 sps:$4 sm:$0xff]  }
  0x42   :  { %670 = vmatmul.mubr.bf16.vlgmr.msra.gmra.mrb[4].mxu1 %v3503_v60  ;;  %v765_v60 = vld [vmem:[%s5882_s2 + $0x20] sm:$0xff] }
  0x43   :  { %3954 = vmatpush3.bf16.msra.mxu1 %v4110_v61  ;;  %751 = vmatprep.mubr.bf16.mxu1 %v3508_v2  ;;  %v766_v61 = vld [vmem:[%s5882_s2 + $0x28] sm:$0xff]  ;;  %v3582_v2 = vcombine.high %v765_v60, %v765_v60 }
  0x44   :  { %3955 = vmatprep.subr.bf16.mxu1 %v4111_v62 }
  0x47   :  { %3956 = vmatpush3.bf16.msra.mxu1 %v4112_v1  ;;  %v911_v1 = vsel %vm897_vm0, %v3577_v59, 0  ;;  %v4210_v59 = vld [vmem:[%s5883_s4 + $0x3a0] ss:$8 sps:$4 sm:$0xff]  }
  0x48   :  { %3957 = vmatprep.subr.bf16.mxu1 %v4113_v3  ;;  %v3584_v3 = vcombine.high %v766_v61, %v766_v61 }
  0x4b   :  { %3958 = vmatpush3.bf16.msra.mxu1 %v4114_v4  ;;  %v3581_v4 = vcombine.low %v765_v60, %v765_v60  ;;  %v4203_v60 = vld [vmem:[%s5883_s4 + $0xb4] ss:$8 sps:$4 sm:$0xff]  }
  0x4c   :  { %3959 = vmatprep.subr.bf16.mxu1 %v4115_v5  ;;  %v3583_v5 = vcombine.low %v766_v61, %v766_v61  ;;  %v4218_v61 = vld [vmem:[%s5883_s4 + $0x3b4] ss:$8 sps:$4 sm:$0xff]  }
  0x4f   :  { %3960 = vmatpush3.bf16.msra.mxu1 %v4116_v6  ;;  %v767_v6 = vld [vmem:[%s5882_s2 + $0x30] sm:$0xff] }
  0x50   :  { %3961 = vmatprep.subr.bf16.mxu1 %v4117_v7  ;;  %v768_v7 = vld [vmem:[%s5882_s2 + $0x38] sm:$0xff] }
  0x53   :  { %3962 = vmatpush3.bf16.msra.mxu1 %v4118_v8  ;;  %v923_v8 = vsel %vm897_vm0, %v3581_v4, 0  ;;  %v4221_v4 = vld [vmem:[%s5883_s4 + $0xe4] ss:$8 sps:$4 sm:$0xff]  }
  0x54   :  { %3963 = vmatprep.subr.bf16.mxu1 %v4119_v9  ;;  %v929_v9 = vsel %vm897_vm0, %v3583_v5, 0  ;;  %v4224_v5 = vld [vmem:[%s5883_s4 + $0x3c4] ss:$8 sps:$4 sm:$0xff]  }
  0x57   :  { %3964 = vmatpush3.bf16.msra.mxu1 %v4120_v10  ;;  %v3586_v10 = vcombine.high %v767_v6, %v767_v6 }
  0x58   :  { %3965 = vmatprep.subr.bf16.mxu1 %v4121_v11  ;;  %v3588_v11 = vcombine.high %v768_v7, %v768_v7 }
  0x5b   :  { %3966 = vmatpush3.bf16.msra.mxu1 %v4122_v12  ;;  %v3585_v12 = vcombine.low %v767_v6, %v767_v6  ;;  %v4219_v6 = vld [vmem:[%s5883_s4 + $0xe0] ss:$8 sps:$4 sm:$0xff]  }
  0x5c   :  { %3967 = vmatprep.subr.bf16.mxu1 %v4123_v13  ;;  %v3587_v13 = vcombine.low %v768_v7, %v768_v7  ;;  %v4222_v7 = vld [vmem:[%s5883_s4 + $0x3c0] ss:$8 sps:$4 sm:$0xff]  }
  0x5f   :  { %3968 = vmatpush3.bf16.msra.mxu1 %v4124_v14  ;;  %v935_v14 = vsel %vm897_vm0, %v3585_v12, 0  ;;  %v773_v12 = vlaneseq }
  0x60   :  { %3591 = vmatprep.subr.msk.bf16.mxu1 %vm897_vm0, %v3576_v18  ;;  %v4141_v18 = vld [vmem:[%s5883_s4] ss:$8 sps:$4 sm:$0xff]  }
  0x62   :  { %752 = vmatmul.mubr.bf16.vlgmr.msra.gmra.mrb[8].mxu1 %v3507_v15  ;;  %v941_v15 = vsel %vm897_vm0, %v3587_v13, 0  ;;  %v4233_v13 = vld [vmem:[%s5883_s4 + $0x104] ss:$8 sps:$4 sm:$0xff]  }
  0x63   :  { %990 = vmatpush1.bf16.msra.mxu1 %v905_v22  ;;  %1021 = vmatprep.mubr.bf16.mxu1 %v4549_v25  ;;  %v4144_v22 = vld [vmem:[%s5883_s4 + $0x10] ss:$8 sps:$4 sm:$0xff]  }
  0x64   :  { %3595 = vmatprep.subr.msk.bf16.mxu1 %vm897_vm0, %v3580_v26  ;;  %v4147_v26 = vld [vmem:[%s5883_s4 + $0x20] ss:$8 sps:$4 sm:$0xff]  }
  0xf5   :  { %v3903_v29 = vpop.f32.mrb[0].mxu1 }
  0xf6   :  { %v3904_v30 = vpop.f32.mrb[1].mxu1 }
  0xf7   :  { %v3905_v31 = vadd.f32 %v3904_v30, %v3903_v29  ;;  %v3906_v32 = vpop.f32.mrb[2].mxu1  ;;  %v4170_v29 = vld [vmem:[%s5883_s4 + $0x334] ss:$8 sps:$4 sm:$0xff]   ;;  %v4153_v30 = vld [vmem:[%s5883_s4 + $0x30] ss:$8 sps:$4 sm:$0xff]  }
  0xf8   :  { %v3907_v33 = vpop.f32.mrb[3].mxu1 }
  0xf9   :  { %v3908_v34 = vadd.f32 %v3907_v33, %v3906_v32  ;;  %v4161_v32 = vld [vmem:[%s5883_s4 + $0x44] ss:$8 sps:$4 sm:$0xff]  }
  0xfa   :  { %v4176_v33 = vld [vmem:[%s5883_s4 + $0x344] ss:$8 sps:$4 sm:$0xff]  }
  0xfb   :  { %v3947_v35 = vpop.f32.mrb[0].mxu0 }
  0xfc   :  { %v3948_v36 = vpop.f32.mrb[1].mxu0 }
  0xfd   :  { %v3949_v37 = vadd.f32 %v3948_v36, %v3947_v35  ;;  %v3950_v38 = vpop.f32.mrb[2].mxu0  ;;  %v4174_v35 = vld [vmem:[%s5883_s4 + $0x340] ss:$8 sps:$4 sm:$0xff]   ;;  %v4167_v36 = vld [vmem:[%s5883_s4 + $0x54] ss:$8 sps:$4 sm:$0xff]  }
  0xfe   :  { %v3951_v39 = vpop.f32.mrb[3].mxu0 }
  0xff   :  { %v3952_v40 = vadd.f32 %v3951_v39, %v3950_v38  ;;  %v4165_v38 = vld [vmem:[%s5883_s4 + $0x50] ss:$8 sps:$4 sm:$0xff]  }
 0x100   :  { %v4180_v39 = vld [vmem:[%s5883_s4 + $0x350] ss:$8 sps:$4 sm:$0xff]  }
 0x115   :  { %v3925_v41 = vpop.f32.mrb[4].mxu1 }
 0x116   :  { %v3926_v42 = vpop.f32.mrb[5].mxu1 }
 0x117   :  { %v3927_v43 = vadd.f32 %v3926_v42, %v3925_v41  ;;  %v3928_v44 = vpop.f32.mrb[6].mxu1  ;;  %v4188_v41 = vld [vmem:[%s5883_s4 + $0x364] ss:$8 sps:$4 sm:$0xff]   ;;  %v4171_v42 = vld [vmem:[%s5883_s4 + $0x60] ss:$8 sps:$4 sm:$0xff]  }
 0x118   :  { %v3929_v45 = vpop.f32.mrb[7].mxu1 }
 0x119   :  { %v672_v46 = vadd.f32 %v3927_v43, %v3905_v31  ;;  %v3930_v47 = vadd.f32 %v3929_v45, %v3928_v44  ;;  %v4168_v31 = vld [vmem:[%s5883_s4 + $0x330] ss:$8 sps:$4 sm:$0xff]   ;;  %v4186_v43 = vld [vmem:[%s5883_s4 + $0x360] ss:$8 sps:$4 sm:$0xff]   ;;  %v4179_v44 = vld [vmem:[%s5883_s4 + $0x74] ss:$8 sps:$4 sm:$0xff]  }
 0x11a   :  { %v4194_v45 = vld [vmem:[%s5883_s4 + $0x374] ss:$8 sps:$4 sm:$0xff]  }
 0x11b   :  { %v675_v48 = vadd.f32 %v3930_v47, %v3908_v34  ;;  %v713_v49 = vadd.f32 %v3949_v37, %v672_v46  ;;  %v4159_v34 = vld [vmem:[%s5883_s4 + $0x40] ss:$8 sps:$4 sm:$0xff]   ;;  %v4182_v37 = vld [vmem:[%s5883_s4 + $0x354] ss:$8 sps:$4 sm:$0xff]   ;;  %v4177_v46 = vld [vmem:[%s5883_s4 + $0x70] ss:$8 sps:$4 sm:$0xff]  }
 0x11c   :  { %v4192_v47 = vld [vmem:[%s5883_s4 + $0x370] ss:$8 sps:$4 sm:$0xff]  }
 0x11d   :  { %v716_v50 = vadd.f32 %v3952_v40, %v675_v48  ;;  %v4173_v40 = vld [vmem:[%s5883_s4 + $0x64] ss:$8 sps:$4 sm:$0xff]  }
 0x11e   :  { %v4185_v48 = vld [vmem:[%s5883_s4 + $0x84] ss:$8 sps:$4 sm:$0xff]  }
 0x135   :  { %v3969_v51 = vpop.f32.mrb[8].mxu1 }
 0x136   :  { %v3970_v52 = vpop.f32.mrb[9].mxu1 }
 0x137   :  { %v3971_v53 = vadd.f32 %v3970_v52, %v3969_v51  ;;  %v3972_v54 = vpop.f32.mrb[10].mxu1  ;;  %v4198_v51 = vld [vmem:[%s5883_s4 + $0x380] ss:$8 sps:$4 sm:$0xff]   ;;  %v4191_v52 = vld [vmem:[%s5883_s4 + $0x94] ss:$8 sps:$4 sm:$0xff]  }
 0x138   :  { %v3973_v55 = vpop.f32.mrb[11].mxu1 }
 0x139   :  { %v754_v56 = vadd.f32 %v3971_v53, %v713_v49  ;;  %v3974_v57 = vadd.f32 %v3973_v55, %v3972_v54  ;;  %v4200_v49 = vld [vmem:[%s5883_s4 + $0x384] ss:$8 sps:$4 sm:$0xff]   ;;  %v4206_v53 = vld [vmem:[%s5883_s4 + $0x394] ss:$8 sps:$4 sm:$0xff]   ;;  %v4189_v54 = vld [vmem:[%s5883_s4 + $0x90] ss:$8 sps:$4 sm:$0xff]  }
 0x13a   :  { %v4204_v55 = vld [vmem:[%s5883_s4 + $0x390] ss:$8 sps:$4 sm:$0xff]  }
 0x13b   :  { %v757_v62 = vadd.f32 %v3974_v57, %v716_v50  ;;  %v4183_v50 = vld [vmem:[%s5883_s4 + $0x80] ss:$8 sps:$4 sm:$0xff]   ;;  %v4212_v57 = vld [vmem:[%s5883_s4 + $0x3a4] ss:$8 sps:$4 sm:$0xff]  }
 0x13d   :  { %v760_v63 = vpack.c.bf16 %v757_v62, %v754_v56  ;;  %v4197_v56 = vld [vmem:[%s5883_s4 + $0xa4] ss:$8 sps:$4 sm:$0xff]   ;;  %v4201_v62 = vld [vmem:[%s5883_s4 + $0xb0] ss:$8 sps:$4 sm:$0xff]  }
 0x13f   :  { %3590 = vmatmul.mubr.msk.bf16.vlgmr.msra.gmra.mrb[4].mxu0 %vm893_vm1, %v760_v63  ;;  %3592 = vmatmul.mubr.msk.bf16.vlgmr.msra.gmra.mrb[12].mxu1 %vm893_vm1, %v760_v63 }
 0x140   :  { %1076 = vmatpush1.bf16.msra.mxu1 %v917_v0  ;;  %1033 = vmatpush1.bf16.msra.mxu0 %v911_v1  ;;  %v4209_v0 = vld [vmem:[%s5883_s4 + $0xc4] ss:$8 sps:$4 sm:$0xff]   ;;  %v4207_v1 = vld [vmem:[%s5883_s4 + $0xc0] ss:$8 sps:$4 sm:$0xff]  }
 0x141   :  { %1064 = vmatprep.mubr.bf16.mxu0 %v4549_v25  ;;  %1107 = vmatprep.mubr.bf16.mxu1 %v4549_v25 }
 0x142   :  { %3597 = vmatprep.subr.msk.bf16.mxu0 %vm897_vm0, %v3582_v2  ;;  %3599 = vmatprep.subr.msk.bf16.mxu1 %vm897_vm0, %v3584_v3  ;;  %v4215_v2 = vld [vmem:[%s5883_s4 + $0xd4] ss:$8 sps:$4 sm:$0xff]   ;;  %v4213_v3 = vld [vmem:[%s5883_s4 + $0xd0] ss:$8 sps:$4 sm:$0xff]  }
 0x147   :  { %3594 = vmatmul.mubr.msk.bf16.vlgmr.msra.gmra.mrb[8].mxu0 %vm893_vm1, %v760_v63  ;;  %3596 = vmatmul.mubr.msk.bf16.vlgmr.msra.gmra.mrb[16].mxu1 %vm893_vm1, %v760_v63 }
 0x148   :  { %1119 = vmatpush1.bf16.msra.mxu0 %v923_v8  ;;  %1162 = vmatpush1.bf16.msra.mxu1 %v929_v9  ;;  %v4227_v8 = vld [vmem:[%s5883_s4 + $0xf4] ss:$8 sps:$4 sm:$0xff]  }
 0x149   :  { %1150 = vmatprep.mubr.bf16.mxu0 %v4549_v25  ;;  %1193 = vmatprep.mubr.bf16.mxu1 %v4549_v25  ;;  %v4230_v9 = vld [vmem:[%s5883_s4 + $0x3d4] ss:$8 sps:$4 sm:$0xff]  }
 0x14a   :  { %3601 = vmatprep.subr.msk.bf16.mxu0 %vm897_vm0, %v3586_v10  ;;  %3603 = vmatprep.subr.msk.bf16.mxu1 %vm897_vm0, %v3588_v11  ;;  %v4225_v10 = vld [vmem:[%s5883_s4 + $0xf0] ss:$8 sps:$4 sm:$0xff]  }
 0x14b   :  { %v4228_v11 = vld [vmem:[%s5883_s4 + $0x3d0] ss:$8 sps:$4 sm:$0xff]  }
 0x14f   :  { %3598 = vmatmul.mubr.msk.bf16.vlgmr.msra.gmra.mrb[12].mxu0 %vm893_vm1, %v760_v63  ;;  %3600 = vmatmul.mubr.msk.bf16.vlgmr.msra.gmra.mrb[20].mxu1 %vm893_vm1, %v760_v63 }
 0x150   :  { %1205 = vmatpush1.bf16.msra.mxu0 %v935_v14  ;;  %1248 = vmatpush1.bf16.msra.mxu1 %v941_v15  ;;  %v4236_v14 = vld [vmem:[%s5883_s4 + $0x3e4] ss:$8 sps:$4 sm:$0xff]   ;;  %v4234_v15 = vld [vmem:[%s5883_s4 + $0x3e0] ss:$8 sps:$4 sm:$0xff]  }
 0x151   :  { %1236 = vmatprep.mubr.bf16.mxu0 %v4549_v25  ;;  %1279 = vmatprep.mubr.bf16.mxu1 %v4549_v25  ;;  %v4164_v25 = vld [vmem:[%s5883_s4 + $0x324] ss:$8 sps:$4 sm:$0xff]  }
 0x152   :  { %2854 = vmatprep.subr.bf16.mxu1 %v4143_v16  ;;  %2983 = vmatprep.subr.bf16.mxu0 %v4152_v17  ;;  %v5068_v16 = vshrl.u32 %v773_v12, 7  ;;  %v4242_v17 = vld [vmem:[%s5883_s4 + $0x3f4] ss:$8 sps:$4 sm:$0xff]  }
 0x157   :  { %3602 = vmatmul.mubr.msk.bf16.vlgmr.msra.gmra.mrb[16].mxu0 %vm893_vm1, %v760_v63  ;;  %3604 = vmatmul.mubr.msk.bf16.vlgmr.msra.gmra.mrb[24].mxu1 %vm893_vm1, %v760_v63  ;;  %v4216_v63 = vld [vmem:[%s5883_s4 + $0x3b0] ss:$8 sps:$4 sm:$0xff]  }
 0x158   :  { %2855 = vmatpush1.bf16.msra.mxu1 %v4141_v18  ;;  %2984 = vmatpush1.bf16.msra.mxu0 %v4150_v19  ;;  %v4240_v18 = vld [vmem:[%s5883_s4 + $0x3f0] ss:$8 sps:$4 sm:$0xff]   ;;  %v783_v19 = vsub.s32 2, %v5068_v16 }
 0x159   :  { %2856 = vmatprep.subr.bf16.mxu1 %v4146_v20  ;;  %2985 = vmatprep.subr.bf16.mxu0 %v4158_v21  ;;  %v5080_v20 = vld [vmem:[%s5884_s3 + $0x8] sm:$0xff] }
 0x15a   :  { %v4248_v21 = vld [vmem:[%s5883_s4 + $0x404] ss:$8 sps:$4 sm:$0xff]  }
 0x15c   :  { %2857 = vmatpush1.bf16.msra.mxu1 %v4144_v22  ;;  %2986 = vmatpush1.bf16.msra.mxu0 %v4156_v23  ;;  %v5086_v22 = vrot.slane %v5080_v20, %v783_v19  ;;  %v791_v23 = vsub.s32 4, %v5068_v16 }
 0x15d   :  { %2858 = vmatprep.subr.bf16.mxu1 %v4149_v24  ;;  %2987 = vmatprep.subr.bf16.mxu0 %v4164_v25  ;;  %v799_v24 = vsub.s32 6, %v5068_v16 }
 0x15e   :  { %v5091_v25 = vrot.slane %v5080_v20, %v791_v23 }
 0x160   :  { %2859 = vmatpush1.bf16.msra.mxu1 %v4147_v26  ;;  %2988 = vmatpush1.bf16.msra.mxu0 %v4162_v27  ;;  %v795_v26 = vsub.s32 5, %v5068_v16  ;;  %v803_v27 = vsub.s32 7, %v5068_v16 }
 0x161   :  { %2860 = vmatprep.subr.bf16.mxu1 %v4155_v28  ;;  %2989 = vmatprep.subr.bf16.mxu0 %v4170_v29  ;;  %v5096_v28 = vrot.slane %v5080_v20, %v799_v24 }
 0x162   :  { %v5099_v29 = vrot.slane %v5080_v20, %v795_v26 }
 0x164   :  { %2861 = vmatpush1.bf16.msra.mxu1 %v4153_v30  ;;  %2990 = vmatpush1.bf16.msra.mxu0 %v4168_v31  ;;  %v5102_v30 = vrot.slane %v5080_v20, %v803_v27  ;;  %v5105_v31 = vsub.s32 0, %v5068_v16 }
 0x165   :  { %2862 = vmatprep.subr.bf16.mxu1 %v4161_v32  ;;  %2991 = vmatprep.subr.bf16.mxu0 %v4176_v33  ;;  %v769_v32 = vld [vmem:[%s5884_s3] sm:$0xff]  ;;  %v5111_v33 = vsub.s32 1, %v5068_v16 }
 0x168   :  { %2863 = vmatpush1.bf16.msra.mxu1 %v4159_v34  ;;  %2992 = vmatpush1.bf16.msra.mxu0 %v4174_v35  ;;  %v787_v34 = vsub.s32 3, %v5068_v16  ;;  %v776_v35 = vrot.slane %v769_v32, %v5105_v31 }
 0x169   :  { %2864 = vmatprep.subr.bf16.mxu1 %v4167_v36  ;;  %2993 = vmatprep.subr.bf16.mxu0 %v4182_v37  ;;  %v784_v36 = vrot.slane %v769_v32, %v783_v19 }
 0x16c   :  { %2865 = vmatpush1.bf16.msra.mxu1 %v4165_v38  ;;  %2994 = vmatpush1.bf16.msra.mxu0 %v4180_v39  ;;  %v780_v39 = vrot.slane %v769_v32, %v5111_v33 }
 0x16d   :  { %2866 = vmatprep.subr.bf16.mxu1 %v4173_v40  ;;  %2995 = vmatprep.subr.bf16.mxu0 %v4188_v41  ;;  %v788_v40 = vrot.slane %v769_v32, %v787_v34 }
 0x170   :  { %2867 = vmatpush1.bf16.msra.mxu1 %v4171_v42  ;;  %2996 = vmatpush1.bf16.msra.mxu0 %v4186_v43 }
 0x171   :  { %2868 = vmatprep.subr.bf16.mxu1 %v4179_v44  ;;  %2997 = vmatprep.subr.bf16.mxu0 %v4194_v45 }
 0x174   :  { %2869 = vmatpush1.bf16.msra.mxu1 %v4177_v46  ;;  %2998 = vmatpush1.bf16.msra.mxu0 %v4192_v47 }
 0x175   :  { %2870 = vmatprep.subr.bf16.mxu1 %v4185_v48  ;;  %2999 = vmatprep.subr.bf16.mxu0 %v4200_v49 }
 0x178   :  { %2871 = vmatpush1.bf16.msra.mxu1 %v4183_v50  ;;  %3000 = vmatpush1.bf16.msra.mxu0 %v4198_v51 }
 0x179   :  { %2872 = vmatprep.subr.bf16.mxu1 %v4191_v52  ;;  %3001 = vmatprep.subr.bf16.mxu0 %v4206_v53 }
 0x17c   :  { %2873 = vmatpush1.bf16.msra.mxu1 %v4189_v54  ;;  %3002 = vmatpush1.bf16.msra.mxu0 %v4204_v55 }
 0x17d   :  { %2874 = vmatprep.subr.bf16.mxu1 %v4197_v56  ;;  %3003 = vmatprep.subr.bf16.mxu0 %v4212_v57 }
 0x180   :  { %2875 = vmatpush1.bf16.msra.mxu1 %v4195_v58  ;;  %3004 = vmatpush1.bf16.msra.mxu0 %v4210_v59  ;;  %v4231_v59 = vld [vmem:[%s5883_s4 + $0x100] ss:$8 sps:$4 sm:$0xff]  }
 0x181   :  { %2876 = vmatprep.subr.bf16.mxu1 %v4203_v60  ;;  %3005 = vmatprep.subr.bf16.mxu0 %v4218_v61  ;;  %v792_v60 = vrot.slane %v769_v32, %v791_v23  ;;  %v800_v61 = vrot.slane %v769_v32, %v799_v24 }
 0x184   :  { %2877 = vmatpush1.bf16.msra.mxu1 %v4201_v62  ;;  %3006 = vmatpush1.bf16.msra.mxu0 %v4216_v63  ;;  %v4239_v62 = vld [vmem:[%s5883_s4 + $0x114] ss:$8 sps:$4 sm:$0xff]  }
 0x185   :  { %2878 = vmatprep.subr.bf16.mxu1 %v4209_v0  ;;  %3007 = vmatprep.subr.bf16.mxu0 %v4224_v5 }
 0x188   :  { %2879 = vmatpush1.bf16.msra.mxu1 %v4207_v1  ;;  %3008 = vmatpush1.bf16.msra.mxu0 %v4222_v7  ;;  %v796_v1 = vrot.slane %v769_v32, %v795_v26  ;;  %v4237_v7 = vld [vmem:[%s5883_s4 + $0x110] ss:$8 sps:$4 sm:$0xff]   ;;  %v4243_v26 = vld [vmem:[%s5883_s4 + $0x120] ss:$8 sps:$4 sm:$0xff]  }
 0x189   :  { %2880 = vmatprep.subr.bf16.mxu1 %v4215_v2  ;;  %3009 = vmatprep.subr.bf16.mxu0 %v4230_v9  ;;  %v804_v2 = vrot.slane %v769_v32, %v803_v27  ;;  %v4246_v27 = vld [vmem:[%s5883_s4 + $0x400] ss:$8 sps:$4 sm:$0xff]   ;;  %v820_v32 = vrot.slane %v5080_v20, %v787_v34 }
 0x18c   :  { %2881 = vmatpush1.bf16.msra.mxu1 %v4213_v3  ;;  %3010 = vmatpush1.bf16.msra.mxu0 %v4228_v11 }
 0x18d   :  { %2882 = vmatprep.subr.bf16.mxu1 %v4221_v4  ;;  %3011 = vmatprep.subr.bf16.mxu0 %v4236_v14  ;;  %v4245_v14 = vld [vmem:[%s5883_s4 + $0x124] ss:$8 sps:$4 sm:$0xff]  }
 0x190   :  { %2883 = vmatpush1.bf16.msra.mxu1 %v4219_v6  ;;  %3012 = vmatpush1.bf16.msra.mxu0 %v4234_v15 }
 0x191   :  { %2884 = vmatprep.subr.bf16.mxu1 %v4227_v8  ;;  %3013 = vmatprep.subr.bf16.mxu0 %v4242_v17 }
 0x194   :  { %2885 = vmatpush1.bf16.msra.mxu1 %v4225_v10  ;;  %3014 = vmatpush1.bf16.msra.mxu0 %v4240_v18 }
 0x195   :  { %2897 = vmatprep.subr.bf16.mxu1 %v4233_v13  ;;  %3026 = vmatprep.subr.bf16.mxu0 %v4248_v21 }
 0x212   :  { %v980_v37 = vpop.f32.mrb[4].mxu0  ;;  %v1023_v38 = vpop.f32.mrb[12].mxu1 }
 0x213   :  { %v982_v41 = vpop.f32.mrb[5].mxu0  ;;  %v1025_v42 = vpop.f32.mrb[13].mxu1  ;;  %v981_v45 = vadd.f32 %v980_v37, %v776_v35  ;;  %v5116_v46 = vadd.f32 %v1023_v38, %v784_v36  ;;  %v4254_v37 = vld [vmem:[%s5883_s4 + $0x414] ss:$8 sps:$4 sm:$0xff]  }
 0x214   :  { %v984_v43 = vpop.f32.mrb[6].mxu0  ;;  %v1027_v44 = vpop.f32.mrb[14].mxu1  ;;  %v983_v51 = vadd.f32 %v982_v41, %v780_v39  ;;  %v1026_v52 = vadd.f32 %v1025_v42, %v788_v40 }
 0x215   :  { %v985_v47 = vadd.f32 %v984_v43, %v776_v35  ;;  %v5118_v48 = vadd.f32 %v1027_v44, %v784_v36  ;;  %v986_v49 = vpop.f32.mrb[7].mxu0  ;;  %v1029_v50 = vpop.f32.mrb[15].mxu1  ;;  %v808_v35 = vrot.slane %v5080_v20, %v5105_v31  ;;  %v4251_v36 = vld [vmem:[%s5883_s4 + $0x134] ss:$8 sps:$4 sm:$0xff]  }
 0x216   :  { %v987_v53 = vadd.f32 %v986_v49, %v780_v39  ;;  %v1030_v54 = vadd.f32 %v1029_v50, %v788_v40  ;;  %v812_v40 = vrot.slane %v5080_v20, %v5111_v33  ;;  %v4252_v20 = vld [vmem:[%s5883_s4 + $0x410] ss:$8 sps:$4 sm:$0xff]  }
 0x217   :  { %v1290_v55 = vpack.c.bf16 %v985_v47, %v981_v45  ;;  %v1292_v56 = vpack.c.bf16 %v5118_v48, %v5116_v46  ;;  %v4249_v47 = vld [vmem:[%s5883_s4 + $0x130] ss:$8 sps:$4 sm:$0xff]   ;;  %v4341_v46 = vld [vmem:[%s5883_s4 + $0x224] ss:$8 sps:$4 sm:$0xff]  }
 0x218   :  { %v1291_v57 = vpack.c.bf16 %v987_v53, %v983_v51  ;;  %v1293_v58 = vpack.c.bf16 %v1030_v54, %v1026_v52  ;;  %v4257_v54 = vld [vmem:[%s5883_s4 + $0x144] ss:$8 sps:$4 sm:$0xff]  }
 0x219   :  { %v4344_v48 = vld [vmem:[%s5883_s4 + $0x504] ss:$8 sps:$4 sm:$0xff]  }
 0x21a   :  { %v1066_v63 = vpop.f32.mrb[8].mxu0  ;;  %v1109_v0 = vpop.f32.mrb[16].mxu1  ;;  %2886 = vmatprep.mubr.bf16.mxu1 %v1291_v57 }
 0x21b   :  { %v1068_v3 = vpop.f32.mrb[9].mxu0  ;;  %v1111_v4 = vpop.f32.mrb[17].mxu1  ;;  %2887 = vmatmul.mubr.bf16.vlgmr.msra.gmra.mrb[28].mxu1 %v1290_v55  ;;  %v5131_v8 = vadd.f32 %v1066_v63, %v792_v60  ;;  %v1110_v9 = vadd.f32 %v1109_v0, %v800_v61  ;;  %v4260_v55 = vld [vmem:[%s5883_s4 + $0x424] ss:$8 sps:$4 sm:$0xff]   ;;  %v4255_v63 = vld [vmem:[%s5883_s4 + $0x140] ss:$8 sps:$4 sm:$0xff]  }
 0x21c   :  { %2898 = vmatpush1.bf16.msra.mxu1 %v4231_v59  ;;  %v1070_v5 = vpop.f32.mrb[10].mxu0  ;;  %v1113_v6 = vpop.f32.mrb[18].mxu1  ;;  %2929 = vmatprep.mubr.bf16.mxu1 %v1293_v58  ;;  %v5138_v15 = vadd.f32 %v1068_v3, %v796_v1  ;;  %v1112_v16 = vadd.f32 %v1111_v4, %v804_v2  ;;  %v4258_v0 = vld [vmem:[%s5883_s4 + $0x420] ss:$8 sps:$4 sm:$0xff]  }
 0x21d   :  { %v5133_v10 = vadd.f32 %v1070_v5, %v792_v60  ;;  %v1114_v11 = vadd.f32 %v1113_v6, %v800_v61  ;;  %v1072_v12 = vpop.f32.mrb[11].mxu0  ;;  %v1115_v13 = vpop.f32.mrb[19].mxu1  ;;  %2899 = vmatprep.subr.bf16.mxu1 %v4239_v62 }
 0x21e   :  { %v5140_v17 = vadd.f32 %v1072_v12, %v796_v1  ;;  %v1116_v18 = vadd.f32 %v1115_v13, %v804_v2  ;;  %v4263_v1 = vld [vmem:[%s5883_s4 + $0x154] ss:$8 sps:$4 sm:$0xff]  }
 0x21f   :  { %v1294_v19 = vpack.c.bf16 %v5133_v10, %v5131_v8  ;;  %v1296_v21 = vpack.c.bf16 %v1114_v11, %v1110_v9  ;;  %v4266_v2 = vld [vmem:[%s5883_s4 + $0x434] ss:$8 sps:$4 sm:$0xff]   ;;  %v4432_v10 = vld [vmem:[%s5883_s4 + $0x610] ss:$8 sps:$4 sm:$0xff]  }
 0x220   :  { %v1295_v23 = vpack.c.bf16 %v5140_v17, %v5138_v15  ;;  %v1297_v24 = vpack.c.bf16 %v1116_v18, %v1112_v16  ;;  %2900 = vmatpush1.bf16.msra.mxu1 %v4237_v7  ;;  %v4261_v16 = vld [vmem:[%s5883_s4 + $0x150] ss:$8 sps:$4 sm:$0xff]   ;;  %v4342_v15 = vld [vmem:[%s5883_s4 + $0x500] ss:$8 sps:$4 sm:$0xff]   ;;  %v4347_v17 = vld [vmem:[%s5883_s4 + $0x234] ss:$8 sps:$4 sm:$0xff]  }
 0x221   :  { %2901 = vmatprep.subr.bf16.mxu1 %v4245_v14  ;;  %v4264_v18 = vld [vmem:[%s5883_s4 + $0x430] ss:$8 sps:$4 sm:$0xff]   ;;  %v4434_v8 = vld [vmem:[%s5883_s4 + $0x614] ss:$8 sps:$4 sm:$0xff]  }
 0x222   :  { %v1152_v38 = vpop.f32.mrb[12].mxu0  ;;  %v1195_v39 = vpop.f32.mrb[20].mxu1  ;;  %3015 = vmatprep.mubr.bf16.mxu0 %v1297_v24 }
 0x223   :  { %v5164_v34 = vadd.f32 %v1195_v39, %v5086_v22  ;;  %v1154_v41 = vpop.f32.mrb[13].mxu0  ;;  %v1197_v42 = vpop.f32.mrb[21].mxu1  ;;  %3016 = vmatmul.mubr.bf16.vlgmr.msra.gmra.mrb[20].mxu0 %v1296_v21  ;;  %v5174_v49 = vadd.f32 %v1152_v38, %v808_v35 }
 0x224   :  { %v5166_v43 = vadd.f32 %v1197_v42, %v820_v32  ;;  %2902 = vmatpush1.bf16.msra.mxu1 %v4243_v26  ;;  %3027 = vmatpush1.bf16.msra.mxu0 %v4246_v27  ;;  %v1156_v44 = vpop.f32.mrb[14].mxu0  ;;  %v1199_v45 = vpop.f32.mrb[22].mxu1  ;;  %v1155_v57 = vadd.f32 %v1154_v41, %v812_v40  ;;  %v4278_v41 = vld [vmem:[%s5883_s4 + $0x454] ss:$8 sps:$4 sm:$0xff]   ;;  %v4273_v42 = vld [vmem:[%s5883_s4 + $0x170] ss:$8 sps:$4 sm:$0xff]  }
 0x225   :  { %v5176_v50 = vadd.f32 %v1156_v44, %v808_v35  ;;  %v5179_v51 = vadd.f32 %v1199_v45, %v5086_v22  ;;  %v1158_v52 = vpop.f32.mrb[15].mxu0  ;;  %v1201_v53 = vpop.f32.mrb[23].mxu1  ;;  %2903 = vmatprep.subr.bf16.mxu1 %v4251_v36  ;;  %3028 = vmatprep.subr.bf16.mxu0 %v4254_v37  ;;  %v4272_v35 = vld [vmem:[%s5883_s4 + $0x444] ss:$8 sps:$4 sm:$0xff]   ;;  %v4276_v44 = vld [vmem:[%s5883_s4 + $0x450] ss:$8 sps:$4 sm:$0xff]  }
 0x226   :  { %v1159_v58 = vadd.f32 %v1158_v52, %v812_v40  ;;  %v5187_v59 = vadd.f32 %v1201_v53, %v820_v32  ;;  %v4269_v32 = vld [vmem:[%s5883_s4 + $0x164] ss:$8 sps:$4 sm:$0xff]   ;;  %v4275_v40 = vld [vmem:[%s5883_s4 + $0x174] ss:$8 sps:$4 sm:$0xff]   ;;  %v4282_v52 = vld [vmem:[%s5883_s4 + $0x460] ss:$8 sps:$4 sm:$0xff]  }
 0x227   :  { %v1298_v22 = vpack.c.bf16 %v5176_v50, %v5174_v49  ;;  %v1300_v60 = vpack.c.bf16 %v5179_v51, %v5164_v34  ;;  %v4281_v45 = vld [vmem:[%s5883_s4 + $0x184] ss:$8 sps:$4 sm:$0xff]   ;;  %v4287_v53 = vld [vmem:[%s5883_s4 + $0x194] ss:$8 sps:$4 sm:$0xff]   ;;  %v4354_v50 = vld [vmem:[%s5883_s4 + $0x520] ss:$8 sps:$4 sm:$0xff]  }
 0x228   :  { %v1299_v61 = vpack.c.bf16 %v1159_v58, %v1155_v57  ;;  %v1301_v62 = vpack.c.bf16 %v5187_v59, %v5166_v43  ;;  %2904 = vmatpush1.bf16.msra.mxu1 %v4249_v47  ;;  %3029 = vmatpush1.bf16.msra.mxu0 %v4252_v20  ;;  %v4284_v47 = vld [vmem:[%s5883_s4 + $0x464] ss:$8 sps:$4 sm:$0xff]   ;;  %v4279_v20 = vld [vmem:[%s5883_s4 + $0x180] ss:$8 sps:$4 sm:$0xff]   ;;  %v4288_v57 = vld [vmem:[%s5883_s4 + $0x470] ss:$8 sps:$4 sm:$0xff]  }
 0x229   :  { %2905 = vmatprep.subr.bf16.mxu1 %v4257_v54  ;;  %3030 = vmatprep.subr.bf16.mxu0 %v4260_v55  ;;  %v4290_v54 = vld [vmem:[%s5883_s4 + $0x474] ss:$8 sps:$4 sm:$0xff]   ;;  %v4285_v55 = vld [vmem:[%s5883_s4 + $0x190] ss:$8 sps:$4 sm:$0xff]   ;;  %v4293_v58 = vld [vmem:[%s5883_s4 + $0x1a4] ss:$8 sps:$4 sm:$0xff]  }
 0x22a   :  { %v1238_v3 = vpop.f32.mrb[16].mxu0  ;;  %v1281_v4 = vpop.f32.mrb[24].mxu1  ;;  %3058 = vmatprep.mubr.bf16.mxu0 %v1299_v61  ;;  %v4296_v61 = vld [vmem:[%s5883_s4 + $0x484] ss:$8 sps:$4 sm:$0xff]   ;;  %v4351_v43 = vld [vmem:[%s5883_s4 + $0x240] ss:$8 sps:$4 sm:$0xff]  }
 0x22b   :  { %v5208_v5 = vadd.f32 %v1238_v3, %v5091_v25  ;;  %v5211_v6 = vadd.f32 %v1281_v4, %v5096_v28  ;;  %v1240_v7 = vpop.f32.mrb[17].mxu0  ;;  %v1283_v9 = vpop.f32.mrb[25].mxu1  ;;  %v4297_v3 = vld [vmem:[%s5883_s4 + $0x1b0] ss:$8 sps:$4 sm:$0xff]   ;;  %v4356_v49 = vld [vmem:[%s5883_s4 + $0x524] ss:$8 sps:$4 sm:$0xff]  }
 0x22c   :  { %v5214_v11 = vadd.f32 %v1240_v7, %v5099_v29  ;;  %v5217_v12 = vadd.f32 %v1283_v9, %v5102_v30  ;;  %2906 = vmatpush1.bf16.msra.mxu1 %v4255_v63  ;;  %3031 = vmatpush1.bf16.msra.mxu0 %v4258_v0  ;;  %v1242_v13 = vpop.f32.mrb[18].mxu0  ;;  %v1285_v14 = vpop.f32.mrb[26].mxu1  ;;  %v4291_v63 = vld [vmem:[%s5883_s4 + $0x1a0] ss:$8 sps:$4 sm:$0xff]   ;;  %v4300_v4 = vld [vmem:[%s5883_s4 + $0x490] ss:$8 sps:$4 sm:$0xff]  }
 0x22d   :  { %v5226_v21 = vadd.f32 %v1242_v13, %v5091_v25  ;;  %v5229_v24 = vadd.f32 %v1285_v14, %v5096_v28  ;;  %v1244_v26 = vpop.f32.mrb[19].mxu0  ;;  %v1287_v27 = vpop.f32.mrb[27].mxu1  ;;  %2907 = vmatprep.subr.bf16.mxu1 %v4263_v1  ;;  %3032 = vmatprep.subr.bf16.mxu0 %v4266_v2  ;;  %v4294_v0 = vld [vmem:[%s5883_s4 + $0x480] ss:$8 sps:$4 sm:$0xff]   ;;  %v4299_v1 = vld [vmem:[%s5883_s4 + $0x1b4] ss:$8 sps:$4 sm:$0xff]  }
 0x22e   :  { %v5238_v36 = vadd.f32 %v1244_v26, %v5099_v29  ;;  %v5241_v25 = vadd.f32 %v1287_v27, %v5102_v30  ;;  %v4267_v29 = vld [vmem:[%s5883_s4 + $0x160] ss:$8 sps:$4 sm:$0xff]   ;;  %v4302_v2 = vld [vmem:[%s5883_s4 + $0x494] ss:$8 sps:$4 sm:$0xff]   ;;  %v4305_v7 = vld [vmem:[%s5883_s4 + $0x1c4] ss:$8 sps:$4 sm:$0xff]  }
 0x22f   :  { %v1302_v28 = vpack.c.bf16 %v5226_v21, %v5208_v5  ;;  %v1304_v37 = vpack.c.bf16 %v5229_v24, %v5211_v6  ;;  %v4270_v30 = vld [vmem:[%s5883_s4 + $0x440] ss:$8 sps:$4 sm:$0xff]   ;;  %v4308_v9 = vld [vmem:[%s5883_s4 + $0x4a4] ss:$8 sps:$4 sm:$0xff]   ;;  %v4309_v26 = vld [vmem:[%s5883_s4 + $0x1d0] ss:$8 sps:$4 sm:$0xff]  }
 0x230   :  { %v1303_v38 = vpack.c.bf16 %v5238_v36, %v5214_v11  ;;  %v1305_v39 = vpack.c.bf16 %v5241_v25, %v5217_v12  ;;  %2908 = vmatpush1.bf16.msra.mxu1 %v4261_v16  ;;  %3033 = vmatpush1.bf16.msra.mxu0 %v4264_v18  ;;  %v4303_v13 = vld [vmem:[%s5883_s4 + $0x1c0] ss:$8 sps:$4 sm:$0xff]   ;;  %v4311_v16 = vld [vmem:[%s5883_s4 + $0x1d4] ss:$8 sps:$4 sm:$0xff]   ;;  %v4312_v27 = vld [vmem:[%s5883_s4 + $0x4b0] ss:$8 sps:$4 sm:$0xff]  }
 0x231   :  { %2909 = vmatprep.subr.bf16.mxu1 %v4269_v32  ;;  %3034 = vmatprep.subr.bf16.mxu0 %v4272_v35  ;;  %v4306_v14 = vld [vmem:[%s5883_s4 + $0x4a0] ss:$8 sps:$4 sm:$0xff]   ;;  %v4314_v18 = vld [vmem:[%s5883_s4 + $0x4b4] ss:$8 sps:$4 sm:$0xff]   ;;  %v4317_v32 = vld [vmem:[%s5883_s4 + $0x1e4] ss:$8 sps:$4 sm:$0xff]  }
 0x232   :  { %v4320_v35 = vld [vmem:[%s5883_s4 + $0x4c4] ss:$8 sps:$4 sm:$0xff]   ;;  %v4359_v59 = vld [vmem:[%s5883_s4 + $0x254] ss:$8 sps:$4 sm:$0xff]   ;;  %v4435_v34 = vld [vmem:[%s5883_s4 + $0x620] ss:$8 sps:$4 sm:$0xff]  }
 0x233   :  { %v4440_v51 = vld [vmem:[%s5883_s4 + $0x634] ss:$8 sps:$4 sm:$0xff]   ;;  %v4443_v11 = vld [vmem:[%s5883_s4 + $0x644] ss:$8 sps:$4 sm:$0xff]   ;;  %v4441_v36 = vld [vmem:[%s5883_s4 + $0x640] ss:$8 sps:$4 sm:$0xff]  }
 0x234   :  { %2910 = vmatpush1.bf16.msra.mxu1 %v4267_v29  ;;  %3035 = vmatpush1.bf16.msra.mxu0 %v4270_v30  ;;  %v4315_v29 = vld [vmem:[%s5883_s4 + $0x1e0] ss:$8 sps:$4 sm:$0xff]   ;;  %v4488_v12 = vld [vmem:[%s5883_s4 + $0x734] ss:$8 sps:$4 sm:$0xff]   ;;  %v4486_v21 = vld [vmem:[%s5883_s4 + $0x730] ss:$8 sps:$4 sm:$0xff]  }
 0x235   :  { %2911 = vmatprep.subr.bf16.mxu1 %v4275_v40  ;;  %3036 = vmatprep.subr.bf16.mxu0 %v4278_v41  ;;  %v4318_v30 = vld [vmem:[%s5883_s4 + $0x4c0] ss:$8 sps:$4 sm:$0xff]   ;;  %v4323_v40 = vld [vmem:[%s5883_s4 + $0x1f4] ss:$8 sps:$4 sm:$0xff]   ;;  %v4491_v25 = vld [vmem:[%s5883_s4 + $0x744] ss:$8 sps:$4 sm:$0xff]  }
 0x236   :  { %v4326_v41 = vld [vmem:[%s5883_s4 + $0x4d4] ss:$8 sps:$4 sm:$0xff]   ;;  %v4483_v5 = vld [vmem:[%s5883_s4 + $0x720] ss:$8 sps:$4 sm:$0xff]  }
 0x237   :  { %v4539_v6 = vld [vmem:[%s5885_s6 + $0x78] sm:$0xff]  }
 0x238   :  { %2912 = vmatpush1.bf16.msra.mxu1 %v4273_v42  ;;  %3037 = vmatpush1.bf16.msra.mxu0 %v4276_v44  ;;  %v4321_v42 = vld [vmem:[%s5883_s4 + $0x1f0] ss:$8 sps:$4 sm:$0xff]  }
 0x239   :  { %2913 = vmatprep.subr.bf16.mxu1 %v4281_v45  ;;  %3038 = vmatprep.subr.bf16.mxu0 %v4284_v47  ;;  %v4324_v44 = vld [vmem:[%s5883_s4 + $0x4d0] ss:$8 sps:$4 sm:$0xff]   ;;  %v4329_v45 = vld [vmem:[%s5883_s4 + $0x204] ss:$8 sps:$4 sm:$0xff]  }
 0x23a   :  { %v4332_v47 = vld [vmem:[%s5883_s4 + $0x4e4] ss:$8 sps:$4 sm:$0xff]   ;;  %v4540_v24 = vld [vmem:[%s5885_s6 + $0x38] sm:$0xff]  }
 0x23c   :  { %2914 = vmatpush1.bf16.msra.mxu1 %v4279_v20  ;;  %3039 = vmatpush1.bf16.msra.mxu0 %v4282_v52  ;;  %v4327_v20 = vld [vmem:[%s5883_s4 + $0x200] ss:$8 sps:$4 sm:$0xff]  }
 0x23d   :  { %2915 = vmatprep.subr.bf16.mxu1 %v4287_v53  ;;  %3040 = vmatprep.subr.bf16.mxu0 %v4290_v54  ;;  %v4330_v52 = vld [vmem:[%s5883_s4 + $0x4e0] ss:$8 sps:$4 sm:$0xff]   ;;  %v4335_v53 = vld [vmem:[%s5883_s4 + $0x214] ss:$8 sps:$4 sm:$0xff]  }
 0x23e   :  { %v4338_v54 = vld [vmem:[%s5883_s4 + $0x4f4] ss:$8 sps:$4 sm:$0xff]  }
 0x240   :  { %2916 = vmatpush1.bf16.msra.mxu1 %v4285_v55  ;;  %3041 = vmatpush1.bf16.msra.mxu0 %v4288_v57  ;;  %v4333_v55 = vld [vmem:[%s5883_s4 + $0x210] ss:$8 sps:$4 sm:$0xff]  }
 0x241   :  { %2917 = vmatprep.subr.bf16.mxu1 %v4293_v58  ;;  %3042 = vmatprep.subr.bf16.mxu0 %v4296_v61  ;;  %v4336_v57 = vld [vmem:[%s5883_s4 + $0x4f0] ss:$8 sps:$4 sm:$0xff]  }
 0x242   :  { %v4345_v58 = vld [vmem:[%s5883_s4 + $0x230] ss:$8 sps:$4 sm:$0xff]  }
 0x243   :  { %v4348_v61 = vld [vmem:[%s5883_s4 + $0x510] ss:$8 sps:$4 sm:$0xff]  }
 0x244   :  { %2918 = vmatpush1.bf16.msra.mxu1 %v4291_v63  ;;  %3043 = vmatpush1.bf16.msra.mxu0 %v4294_v0  ;;  %v4353_v63 = vld [vmem:[%s5883_s4 + $0x244] ss:$8 sps:$4 sm:$0xff]   ;;  %v4360_v0 = vld [vmem:[%s5883_s4 + $0x530] ss:$8 sps:$4 sm:$0xff]  }
 0x245   :  { %2919 = vmatprep.subr.bf16.mxu1 %v4299_v1  ;;  %3044 = vmatprep.subr.bf16.mxu0 %v4302_v2  ;;  %v4365_v1 = vld [vmem:[%s5883_s4 + $0x264] ss:$8 sps:$4 sm:$0xff]  }
 0x246   :  { %v4368_v2 = vld [vmem:[%s5883_s4 + $0x544] ss:$8 sps:$4 sm:$0xff]  }
 0x248   :  { %2920 = vmatpush1.bf16.msra.mxu1 %v4297_v3  ;;  %3045 = vmatpush1.bf16.msra.mxu0 %v4300_v4  ;;  %v4363_v3 = vld [vmem:[%s5883_s4 + $0x260] ss:$8 sps:$4 sm:$0xff]  }
 0x249   :  { %2921 = vmatprep.subr.bf16.mxu1 %v4305_v7  ;;  %3046 = vmatprep.subr.bf16.mxu0 %v4308_v9  ;;  %v4366_v4 = vld [vmem:[%s5883_s4 + $0x540] ss:$8 sps:$4 sm:$0xff]   ;;  %v4371_v7 = vld [vmem:[%s5883_s4 + $0x274] ss:$8 sps:$4 sm:$0xff]  }
 0x24a   :  { %v4374_v9 = vld [vmem:[%s5883_s4 + $0x554] ss:$8 sps:$4 sm:$0xff]  }
 0x24c   :  { %2922 = vmatpush1.bf16.msra.mxu1 %v4303_v13  ;;  %3047 = vmatpush1.bf16.msra.mxu0 %v4306_v14  ;;  %v4369_v13 = vld [vmem:[%s5883_s4 + $0x270] ss:$8 sps:$4 sm:$0xff]  }
 0x24d   :  { %2923 = vmatprep.subr.bf16.mxu1 %v4311_v16  ;;  %3048 = vmatprep.subr.bf16.mxu0 %v4314_v18  ;;  %v4372_v14 = vld [vmem:[%s5883_s4 + $0x550] ss:$8 sps:$4 sm:$0xff]   ;;  %v4377_v16 = vld [vmem:[%s5883_s4 + $0x284] ss:$8 sps:$4 sm:$0xff]  }
 0x24e   :  { %v4380_v18 = vld [vmem:[%s5883_s4 + $0x564] ss:$8 sps:$4 sm:$0xff]  }
 0x250   :  { %2924 = vmatpush1.bf16.msra.mxu1 %v4309_v26  ;;  %3049 = vmatpush1.bf16.msra.mxu0 %v4312_v27  ;;  %v4375_v26 = vld [vmem:[%s5883_s4 + $0x280] ss:$8 sps:$4 sm:$0xff]  }
 0x251   :  { %2925 = vmatprep.subr.bf16.mxu1 %v4317_v32  ;;  %3050 = vmatprep.subr.bf16.mxu0 %v4320_v35  ;;  %v4378_v27 = vld [vmem:[%s5883_s4 + $0x560] ss:$8 sps:$4 sm:$0xff]   ;;  %v4383_v32 = vld [vmem:[%s5883_s4 + $0x294] ss:$8 sps:$4 sm:$0xff]  }
 0x252   :  { %v4386_v35 = vld [vmem:[%s5883_s4 + $0x574] ss:$8 sps:$4 sm:$0xff]  }
 0x254   :  { %2926 = vmatpush1.bf16.msra.mxu1 %v4315_v29  ;;  %3051 = vmatpush1.bf16.msra.mxu0 %v4318_v30  ;;  %v4381_v29 = vld [vmem:[%s5883_s4 + $0x290] ss:$8 sps:$4 sm:$0xff]  }
 0x255   :  { %2927 = vmatprep.subr.bf16.mxu1 %v4323_v40  ;;  %3052 = vmatprep.subr.bf16.mxu0 %v4326_v41  ;;  %v4384_v30 = vld [vmem:[%s5883_s4 + $0x570] ss:$8 sps:$4 sm:$0xff]   ;;  %v4389_v40 = vld [vmem:[%s5883_s4 + $0x2a4] ss:$8 sps:$4 sm:$0xff]  }
 0x256   :  { %v4392_v41 = vld [vmem:[%s5883_s4 + $0x584] ss:$8 sps:$4 sm:$0xff]  }
 0x258   :  { %2928 = vmatpush1.bf16.msra.mxu1 %v4321_v42  ;;  %3053 = vmatpush1.bf16.msra.mxu0 %v4324_v44  ;;  %v4387_v42 = vld [vmem:[%s5883_s4 + $0x2a0] ss:$8 sps:$4 sm:$0xff]  }
 0x259   :  { %2940 = vmatprep.subr.bf16.mxu1 %v4329_v45  ;;  %3054 = vmatprep.subr.bf16.mxu0 %v4332_v47  ;;  %v4390_v44 = vld [vmem:[%s5883_s4 + $0x580] ss:$8 sps:$4 sm:$0xff]   ;;  %v4395_v45 = vld [vmem:[%s5883_s4 + $0x2b4] ss:$8 sps:$4 sm:$0xff]  }
 0x25a   :  { %v4398_v47 = vld [vmem:[%s5883_s4 + $0x594] ss:$8 sps:$4 sm:$0xff]  }
 0x25b   :  { %2930 = vmatmul.mubr.bf16.vlgmr.msra.gmra.mrb[28].mxu1 %v1292_v56  ;;  %v4339_v56 = vld [vmem:[%s5883_s4 + $0x220] ss:$8 sps:$4 sm:$0xff]  }
 0x25c   :  { %2941 = vmatpush1.bf16.msra.mxu1 %v4327_v20  ;;  %2972 = vmatprep.mubr.bf16.mxu1 %v1295_v23  ;;  %v4350_v23 = vld [vmem:[%s5883_s4 + $0x514] ss:$8 sps:$4 sm:$0xff]   ;;  %v4393_v20 = vld [vmem:[%s5883_s4 + $0x2b0] ss:$8 sps:$4 sm:$0xff]  }
 0x25d   :  { %3055 = vmatpush1.bf16.msra.mxu0 %v4330_v52  ;;  %2942 = vmatprep.subr.bf16.mxu1 %v4335_v53  ;;  %v4396_v52 = vld [vmem:[%s5883_s4 + $0x590] ss:$8 sps:$4 sm:$0xff]   ;;  %v4401_v53 = vld [vmem:[%s5883_s4 + $0x2c4] ss:$8 sps:$4 sm:$0xff]  }
 0x25e   :  { %3056 = vmatprep.subr.bf16.mxu0 %v4338_v54  ;;  %v4404_v54 = vld [vmem:[%s5883_s4 + $0x5a4] ss:$8 sps:$4 sm:$0xff]  }
 0x260   :  { %2943 = vmatpush1.bf16.msra.mxu1 %v4333_v55  ;;  %v4399_v55 = vld [vmem:[%s5883_s4 + $0x2c0] ss:$8 sps:$4 sm:$0xff]  }
 0x261   :  { %3057 = vmatpush1.bf16.msra.mxu0 %v4336_v57  ;;  %2944 = vmatprep.subr.bf16.mxu1 %v4341_v46  ;;  %v4402_v57 = vld [vmem:[%s5883_s4 + $0x5a0] ss:$8 sps:$4 sm:$0xff]   ;;  %v4407_v46 = vld [vmem:[%s5883_s4 + $0x2d4] ss:$8 sps:$4 sm:$0xff]  }
 0x262   :  { %3069 = vmatprep.subr.bf16.mxu0 %v4344_v48  ;;  %v4410_v48 = vld [vmem:[%s5883_s4 + $0x5b4] ss:$8 sps:$4 sm:$0xff]  }
 0x264   :  { %3059 = vmatmul.mubr.bf16.vlgmr.msra.gmra.mrb[20].mxu0 %v1298_v22  ;;  %2945 = vmatpush1.bf16.msra.mxu1 %v4339_v56  ;;  %v4362_v22 = vld [vmem:[%s5883_s4 + $0x534] ss:$8 sps:$4 sm:$0xff]   ;;  %v4405_v56 = vld [vmem:[%s5883_s4 + $0x2d0] ss:$8 sps:$4 sm:$0xff]  }
 0x265   :  { %3070 = vmatpush1.bf16.msra.mxu0 %v4342_v15  ;;  %3101 = vmatprep.mubr.bf16.mxu0 %v1301_v62  ;;  %v4357_v62 = vld [vmem:[%s5883_s4 + $0x250] ss:$8 sps:$4 sm:$0xff]  }
 0x266   :  { %2946 = vmatprep.subr.bf16.mxu1 %v4347_v17  ;;  %3071 = vmatprep.subr.bf16.mxu0 %v4350_v23  ;;  %v4408_v15 = vld [vmem:[%s5883_s4 + $0x5b0] ss:$8 sps:$4 sm:$0xff]   ;;  %v4413_v17 = vld [vmem:[%s5883_s4 + $0x2e4] ss:$8 sps:$4 sm:$0xff]  }
 0x267   :  { %v4416_v23 = vld [vmem:[%s5883_s4 + $0x5c4] ss:$8 sps:$4 sm:$0xff]  }
 0x268   :  { %2947 = vmatpush1.bf16.msra.mxu1 %v4345_v58  ;;  %v4411_v58 = vld [vmem:[%s5883_s4 + $0x2e0] ss:$8 sps:$4 sm:$0xff]  }
 0x269   :  { %3072 = vmatpush1.bf16.msra.mxu0 %v4348_v61  ;;  %2948 = vmatprep.subr.bf16.mxu1 %v4353_v63  ;;  %v4414_v61 = vld [vmem:[%s5883_s4 + $0x5c0] ss:$8 sps:$4 sm:$0xff]   ;;  %v4419_v63 = vld [vmem:[%s5883_s4 + $0x2f4] ss:$8 sps:$4 sm:$0xff]  }
 0x26a   :  { %3073 = vmatprep.subr.bf16.mxu0 %v4356_v49  ;;  %v4422_v49 = vld [vmem:[%s5883_s4 + $0x5d4] ss:$8 sps:$4 sm:$0xff]  }
 0x26c   :  { %2949 = vmatpush1.bf16.msra.mxu1 %v4351_v43  ;;  %v4417_v43 = vld [vmem:[%s5883_s4 + $0x2f0] ss:$8 sps:$4 sm:$0xff]  }
 0x26d   :  { %3074 = vmatpush1.bf16.msra.mxu0 %v4354_v50  ;;  %2950 = vmatprep.subr.bf16.mxu1 %v4359_v59  ;;  %v4420_v50 = vld [vmem:[%s5883_s4 + $0x5d0] ss:$8 sps:$4 sm:$0xff]   ;;  %v4425_v59 = vld [vmem:[%s5883_s4 + $0x5e4] ss:$8 sps:$4 sm:$0xff]  }
 0x26e   :  { %3075 = vmatprep.subr.bf16.mxu0 %v4362_v22  ;;  %v4423_v22 = vld [vmem:[%s5883_s4 + $0x5e0] ss:$8 sps:$4 sm:$0xff]  }
 0x270   :  { %2951 = vmatpush1.bf16.msra.mxu1 %v4357_v62  ;;  %v4428_v62 = vld [vmem:[%s5883_s4 + $0x5f4] ss:$8 sps:$4 sm:$0xff]  }
 0x271   :  { %3076 = vmatpush1.bf16.msra.mxu0 %v4360_v0  ;;  %2952 = vmatprep.subr.bf16.mxu1 %v4365_v1  ;;  %v4426_v0 = vld [vmem:[%s5883_s4 + $0x5f0] ss:$8 sps:$4 sm:$0xff]   ;;  %v4431_v1 = vld [vmem:[%s5883_s4 + $0x604] ss:$8 sps:$4 sm:$0xff]  }
 0x272   :  { %3077 = vmatprep.subr.bf16.mxu0 %v4368_v2  ;;  %v4429_v2 = vld [vmem:[%s5883_s4 + $0x600] ss:$8 sps:$4 sm:$0xff]  }
 0x274   :  { %2953 = vmatpush1.bf16.msra.mxu1 %v4363_v3  ;;  %v4444_v3 = vld [vmem:[%s5883_s4 + $0x650] ss:$8 sps:$4 sm:$0xff]  }
 0x275   :  { %3078 = vmatpush1.bf16.msra.mxu0 %v4366_v4  ;;  %2954 = vmatprep.subr.bf16.mxu1 %v4371_v7  ;;  %v4449_v4 = vld [vmem:[%s5883_s4 + $0x664] ss:$8 sps:$4 sm:$0xff]   ;;  %v4447_v7 = vld [vmem:[%s5883_s4 + $0x660] ss:$8 sps:$4 sm:$0xff]  }
 0x276   :  { %3079 = vmatprep.subr.bf16.mxu0 %v4374_v9  ;;  %v4452_v9 = vld [vmem:[%s5883_s4 + $0x674] ss:$8 sps:$4 sm:$0xff]  }
 0x278   :  { %2955 = vmatpush1.bf16.msra.mxu1 %v4369_v13  ;;  %v4450_v13 = vld [vmem:[%s5883_s4 + $0x670] ss:$8 sps:$4 sm:$0xff]  }
 0x279   :  { %3080 = vmatpush1.bf16.msra.mxu0 %v4372_v14  ;;  %2956 = vmatprep.subr.bf16.mxu1 %v4377_v16  ;;  %v4455_v14 = vld [vmem:[%s5883_s4 + $0x684] ss:$8 sps:$4 sm:$0xff]   ;;  %v4453_v16 = vld [vmem:[%s5883_s4 + $0x680] ss:$8 sps:$4 sm:$0xff]  }
 0x27a   :  { %3081 = vmatprep.subr.bf16.mxu0 %v4380_v18  ;;  %v4458_v18 = vld [vmem:[%s5883_s4 + $0x694] ss:$8 sps:$4 sm:$0xff]  }
 0x27c   :  { %2957 = vmatpush1.bf16.msra.mxu1 %v4375_v26  ;;  %v4456_v26 = vld [vmem:[%s5883_s4 + $0x690] ss:$8 sps:$4 sm:$0xff]  }
 0x27d   :  { %3082 = vmatpush1.bf16.msra.mxu0 %v4378_v27  ;;  %2958 = vmatprep.subr.bf16.mxu1 %v4383_v32  ;;  %v4461_v27 = vld [vmem:[%s5883_s4 + $0x6a4] ss:$8 sps:$4 sm:$0xff]   ;;  %v4459_v32 = vld [vmem:[%s5883_s4 + $0x6a0] ss:$8 sps:$4 sm:$0xff]  }
 0x27e   :  { %3083 = vmatprep.subr.bf16.mxu0 %v4386_v35  ;;  %v4464_v35 = vld [vmem:[%s5883_s4 + $0x6b4] ss:$8 sps:$4 sm:$0xff]  }
 0x280   :  { %2959 = vmatpush1.bf16.msra.mxu1 %v4381_v29  ;;  %v4462_v29 = vld [vmem:[%s5883_s4 + $0x6b0] ss:$8 sps:$4 sm:$0xff]  }
 0x281   :  { %3084 = vmatpush1.bf16.msra.mxu0 %v4384_v30  ;;  %2960 = vmatprep.subr.bf16.mxu1 %v4389_v40  ;;  %v4467_v30 = vld [vmem:[%s5883_s4 + $0x6c4] ss:$8 sps:$4 sm:$0xff]   ;;  %v4465_v40 = vld [vmem:[%s5883_s4 + $0x6c0] ss:$8 sps:$4 sm:$0xff]  }
 0x282   :  { %3085 = vmatprep.subr.bf16.mxu0 %v4392_v41  ;;  %v4470_v41 = vld [vmem:[%s5883_s4 + $0x6d4] ss:$8 sps:$4 sm:$0xff]  }
 0x284   :  { %2961 = vmatpush1.bf16.msra.mxu1 %v4387_v42  ;;  %v4468_v42 = vld [vmem:[%s5883_s4 + $0x6d0] ss:$8 sps:$4 sm:$0xff]  }
 0x285   :  { %3086 = vmatpush1.bf16.msra.mxu0 %v4390_v44  ;;  %2962 = vmatprep.subr.bf16.mxu1 %v4395_v45  ;;  %v4473_v44 = vld [vmem:[%s5883_s4 + $0x6e4] ss:$8 sps:$4 sm:$0xff]   ;;  %v4471_v45 = vld [vmem:[%s5883_s4 + $0x6e0] ss:$8 sps:$4 sm:$0xff]  }
 0x286   :  { %3087 = vmatprep.subr.bf16.mxu0 %v4398_v47  ;;  %v4476_v47 = vld [vmem:[%s5883_s4 + $0x6f4] ss:$8 sps:$4 sm:$0xff]  }
 0x288   :  { %2963 = vmatpush1.bf16.msra.mxu1 %v4393_v20  ;;  %v4474_v20 = vld [vmem:[%s5883_s4 + $0x6f0] ss:$8 sps:$4 sm:$0xff]  }
 0x289   :  { %3088 = vmatpush1.bf16.msra.mxu0 %v4396_v52  ;;  %2964 = vmatprep.subr.bf16.mxu1 %v4401_v53  ;;  %v4479_v52 = vld [vmem:[%s5883_s4 + $0x704] ss:$8 sps:$4 sm:$0xff]   ;;  %v4477_v53 = vld [vmem:[%s5883_s4 + $0x700] ss:$8 sps:$4 sm:$0xff]  }
 0x28a   :  { %3089 = vmatprep.subr.bf16.mxu0 %v4404_v54  ;;  %v4482_v54 = vld [vmem:[%s5883_s4 + $0x714] ss:$8 sps:$4 sm:$0xff]  }
 0x28c   :  { %2965 = vmatpush1.bf16.msra.mxu1 %v4399_v55  ;;  %v4480_v55 = vld [vmem:[%s5883_s4 + $0x710] ss:$8 sps:$4 sm:$0xff]  }
 0x28d   :  { %3090 = vmatpush1.bf16.msra.mxu0 %v4402_v57  ;;  %2966 = vmatprep.subr.bf16.mxu1 %v4407_v46  ;;  %v4485_v57 = vld [vmem:[%s5883_s4 + $0x724] ss:$8 sps:$4 sm:$0xff]   ;;  %v4492_v46 = vld [vmem:[%s5883_s4 + $0x750] ss:$8 sps:$4 sm:$0xff]  }
 0x28e   :  { %3091 = vmatprep.subr.bf16.mxu0 %v4410_v48  ;;  %v4525_v48 = vld [vmem:[%s5885_s6 + $0x40] sm:$0xff]  }
 0x290   :  { %2967 = vmatpush1.bf16.msra.mxu1 %v4405_v56  ;;  %v4497_v56 = vld [vmem:[%s5883_s4 + $0x764] ss:$8 sps:$4 sm:$0xff]  }
 0x291   :  { %3092 = vmatpush1.bf16.msra.mxu0 %v4408_v15  ;;  %2968 = vmatprep.subr.bf16.mxu1 %v4413_v17  ;;  %v4526_v15 = vld [vmem:[%s5885_s6] sm:$0xff]   ;;  %v4527_v17 = vld [vmem:[%s5885_s6 + $0x48] sm:$0xff]  }
 0x292   :  { %3093 = vmatprep.subr.bf16.mxu0 %v4416_v23  ;;  %v4528_v23 = vld [vmem:[%s5885_s6 + $0x8] sm:$0xff]  }
 0x294   :  { %2969 = vmatpush1.bf16.msra.mxu1 %v4411_v58  ;;  %v4529_v58 = vld [vmem:[%s5885_s6 + $0x50] sm:$0xff]  }
 0x295   :  { %3094 = vmatpush1.bf16.msra.mxu0 %v4414_v61  ;;  %2970 = vmatprep.subr.bf16.mxu1 %v4419_v63  ;;  %v4495_v61 = vld [vmem:[%s5883_s4 + $0x760] ss:$8 sps:$4 sm:$0xff]   ;;  %v4500_v63 = vld [vmem:[%s5883_s4 + $0x774] ss:$8 sps:$4 sm:$0xff]  }
 0x296   :  { %3095 = vmatprep.subr.bf16.mxu0 %v4422_v49  ;;  %v4530_v49 = vld [vmem:[%s5885_s6 + $0x10] sm:$0xff]  }
 0x298   :  { %2971 = vmatpush1.bf16.msra.mxu1 %v4417_v43  ;;  %v4498_v43 = vld [vmem:[%s5883_s4 + $0x770] ss:$8 sps:$4 sm:$0xff]  }
 0x299   :  { %3096 = vmatpush1.bf16.msra.mxu0 %v4420_v50  ;;  %3975 = vmatprep.subr.bf16.mxu1 %v4525_v48  ;;  %v4531_v50 = vld [vmem:[%s5885_s6 + $0x58] sm:$0xff]   ;;  %v4543_v48 = vld [vmem:[%s5886_s8 + $0x10] sm:$0xff]  }
 0x29a   :  { %3097 = vmatprep.subr.bf16.mxu0 %v4425_v59  ;;  %v4503_v59 = vld [vmem:[%s5883_s4 + $0x784] ss:$8 sps:$4 sm:$0xff]  }
 0x29b   :  { %2973 = vmatmul.mubr.bf16.vlgmr.msra.gmra.mrb[28].mxu1 %v1294_v19  ;;  %v4437_v19 = vld [vmem:[%s5883_s4 + $0x624] ss:$8 sps:$4 sm:$0xff]  }
 0x29c   :  { %3976 = vmatpush3.bf16.msra.mxu1 %v4526_v15  ;;  %v4545_v15 = vld [vmem:[%s5886_s8 + $0x20] sm:$0xff]  }
 0x29d   :  { %3098 = vmatpush1.bf16.msra.mxu0 %v4423_v22  ;;  %3977 = vmatprep.subr.bf16.mxu1 %v4527_v17  ;;  %v4532_v22 = vld [vmem:[%s5885_s6 + $0x18] sm:$0xff]   ;;  %v4546_v17 = vld [vmem:[%s5886_s8 + $0x28] sm:$0xff]  }
 0x29e   :  { %3099 = vmatprep.subr.bf16.mxu0 %v4428_v62  ;;  %v4533_v62 = vld [vmem:[%s5885_s6 + $0x60] sm:$0xff]  }
 0x2a0   :  { %3978 = vmatpush3.bf16.msra.mxu1 %v4528_v23  ;;  %v4547_v23 = vld [vmem:[%s5886_s8 + $0x30] sm:$0xff]  }
 0x2a1   :  { %3100 = vmatpush1.bf16.msra.mxu0 %v4426_v0  ;;  %3979 = vmatprep.subr.bf16.mxu1 %v4529_v58  ;;  %v4501_v0 = vld [vmem:[%s5883_s4 + $0x780] ss:$8 sps:$4 sm:$0xff]   ;;  %v4548_v58 = vld [vmem:[%s5886_s8 + $0x38] sm:$0xff]  }
 0x2a2   :  { %3112 = vmatprep.subr.bf16.mxu0 %v4431_v1  ;;  %v4506_v1 = vld [vmem:[%s5883_s4 + $0x794] ss:$8 sps:$4 sm:$0xff]  }
 0x2a4   :  { %3102 = vmatmul.mubr.bf16.vlgmr.msra.gmra.mrb[20].mxu0 %v1300_v60  ;;  %v4438_v60 = vld [vmem:[%s5883_s4 + $0x630] ss:$8 sps:$4 sm:$0xff]   ;;  %3980 = vmatpush3.bf16.msra.mxu1 %v4530_v49 }
 0x2a5   :  { %3113 = vmatpush1.bf16.msra.mxu0 %v4429_v2  ;;  %3144 = vmatprep.mubr.bf16.mxu0 %v1303_v38  ;;  %v4446_v38 = vld [vmem:[%s5883_s4 + $0x654] ss:$8 sps:$4 sm:$0xff]   ;;  %v4534_v2 = vld [vmem:[%s5885_s6 + $0x20] sm:$0xff]  }
 0x2a6   :  { %3114 = vmatprep.subr.bf16.mxu0 %v4434_v8  ;;  %3981 = vmatprep.subr.bf16.mxu1 %v4531_v50  ;;  %v4535_v8 = vld [vmem:[%s5885_s6 + $0x68] sm:$0xff]  }
 0x2a8   :  { %3982 = vmatpush3.bf16.msra.mxu1 %v4532_v22 }
 0x2a9   :  { %3115 = vmatpush1.bf16.msra.mxu0 %v4432_v10  ;;  %3983 = vmatprep.subr.bf16.mxu1 %v4533_v62  ;;  %v4504_v10 = vld [vmem:[%s5883_s4 + $0x790] ss:$8 sps:$4 sm:$0xff]  }
 0x2aa   :  { %3116 = vmatprep.subr.bf16.mxu0 %v4437_v19  ;;  %v4509_v19 = vld [vmem:[%s5883_s4 + $0x7a4] ss:$8 sps:$4 sm:$0xff]  }
 0x2ac   :  { %3984 = vmatpush3.bf16.msra.mxu1 %v4534_v2 }
 0x2ad   :  { %3117 = vmatpush1.bf16.msra.mxu0 %v4435_v34  ;;  %3985 = vmatprep.subr.bf16.mxu1 %v4535_v8  ;;  %v4507_v34 = vld [vmem:[%s5883_s4 + $0x7a0] ss:$8 sps:$4 sm:$0xff]  }
 0x2ae   :  { %3118 = vmatprep.subr.bf16.mxu0 %v4440_v51  ;;  %v4512_v51 = vld [vmem:[%s5883_s4 + $0x7b4] ss:$8 sps:$4 sm:$0xff]  }
 0x2b1   :  { %3119 = vmatpush1.bf16.msra.mxu0 %v4438_v60  ;;  %v4510_v60 = vld [vmem:[%s5883_s4 + $0x7b0] ss:$8 sps:$4 sm:$0xff]  }
 0x2b2   :  { %3120 = vmatprep.subr.bf16.mxu0 %v4443_v11  ;;  %v4515_v11 = vld [vmem:[%s5883_s4 + $0x7c4] ss:$8 sps:$4 sm:$0xff]  }
 0x2b5   :  { %3121 = vmatpush1.bf16.msra.mxu0 %v4441_v36  ;;  %v4513_v36 = vld [vmem:[%s5883_s4 + $0x7c0] ss:$8 sps:$4 sm:$0xff]  }
 0x2b6   :  { %3122 = vmatprep.subr.bf16.mxu0 %v4446_v38  ;;  %v4518_v38 = vld [vmem:[%s5883_s4 + $0x7d4] ss:$8 sps:$4 sm:$0xff]  }
 0x2b9   :  { %3123 = vmatpush1.bf16.msra.mxu0 %v4444_v3  ;;  %v4516_v3 = vld [vmem:[%s5883_s4 + $0x7d0] ss:$8 sps:$4 sm:$0xff]  }
 0x2ba   :  { %3124 = vmatprep.subr.bf16.mxu0 %v4449_v4  ;;  %v4521_v4 = vld [vmem:[%s5883_s4 + $0x7e4] ss:$8 sps:$4 sm:$0xff]  }
 0x2bd   :  { %3125 = vmatpush1.bf16.msra.mxu0 %v4447_v7  ;;  %v4519_v7 = vld [vmem:[%s5883_s4 + $0x7e0] ss:$8 sps:$4 sm:$0xff]  }
 0x2be   :  { %3126 = vmatprep.subr.bf16.mxu0 %v4452_v9  ;;  %v4524_v9 = vld [vmem:[%s5883_s4 + $0x7f4] ss:$8 sps:$4 sm:$0xff]  }
 0x2c1   :  { %3127 = vmatpush1.bf16.msra.mxu0 %v4450_v13  ;;  %v4522_v13 = vld [vmem:[%s5883_s4 + $0x7f0] ss:$8 sps:$4 sm:$0xff]  }
 0x2c2   :  { %3128 = vmatprep.subr.bf16.mxu0 %v4455_v14 }
 0x2c5   :  { %3129 = vmatpush1.bf16.msra.mxu0 %v4453_v16 }
 0x2c6   :  { %3130 = vmatprep.subr.bf16.mxu0 %v4458_v18 }
 0x2c9   :  { %3131 = vmatpush1.bf16.msra.mxu0 %v4456_v26 }
 0x2ca   :  { %3132 = vmatprep.subr.bf16.mxu0 %v4461_v27  ;;  %v4536_v27 = vld [vmem:[%s5885_s6 + $0x28] sm:$0xff]  }
 0x2cb   :  { %3986 = vmatpush3.bf16.msra.mxu1 %v4536_v27 }
 0x2cd   :  { %3133 = vmatpush1.bf16.msra.mxu0 %v4459_v32  ;;  %v4537_v32 = vld [vmem:[%s5885_s6 + $0x70] sm:$0xff]  }
 0x2ce   :  { %3134 = vmatprep.subr.bf16.mxu0 %v4464_v35  ;;  %v4538_v35 = vld [vmem:[%s5885_s6 + $0x30] sm:$0xff]   ;;  %3987 = vmatprep.subr.bf16.mxu1 %v4537_v32 }
 0x2cf   :  { %3988 = vmatpush3.bf16.msra.mxu1 %v4538_v35 }
 0x2d0   :  { %3989 = vmatprep.subr.bf16.mxu1 %v4539_v6 }
 0x2d1   :  { %3135 = vmatpush1.bf16.msra.mxu0 %v4462_v29  ;;  %v1562_v29 = vld [vmem:[%s5887_s5] sm:$0x3] }
 0x2d2   :  { %3136 = vmatprep.subr.bf16.mxu0 %v4467_v30  ;;  %v1567_v30 = vrot.slane %v1562_v29, %v5105_v31 }
 0x2d3   :  { %3990 = vmatpush3.bf16.msra.mxu1 %v4540_v24 }
 0x2d5   :  { %3137 = vmatpush1.bf16.msra.mxu0 %v4465_v40  ;;  %v1571_v40 = vrot.slane %v1562_v29, %v5111_v33  ;;  %v4541_v33 = vld [vmem:[%s5886_s8] sm:$0xff]  }
 0x2d6   :  { %3138 = vmatprep.subr.bf16.mxu0 %v4470_v41 }
 0x2d9   :  { %3139 = vmatpush1.bf16.msra.mxu0 %v4468_v42 }
 0x2da   :  { %3140 = vmatprep.subr.bf16.mxu0 %v4473_v44 }
 0x2dd   :  { %3141 = vmatpush1.bf16.msra.mxu0 %v4471_v45 }
 0x2de   :  { %3142 = vmatprep.subr.bf16.mxu0 %v4476_v47 }
 0x2e1   :  { %3143 = vmatpush1.bf16.msra.mxu0 %v4474_v20 }
 0x2e2   :  { %3155 = vmatprep.subr.bf16.mxu0 %v4479_v52 }
 0x2e4   :  { %3145 = vmatmul.mubr.bf16.vlgmr.msra.gmra.mrb[20].mxu0 %v1302_v28  ;;  %v4489_v28 = vld [vmem:[%s5883_s4 + $0x740] ss:$8 sps:$4 sm:$0xff]  }
 0x2e5   :  { %3156 = vmatpush1.bf16.msra.mxu0 %v4477_v53  ;;  %3187 = vmatprep.mubr.bf16.mxu0 %v1305_v39  ;;  %v4494_v39 = vld [vmem:[%s5883_s4 + $0x754] ss:$8 sps:$4 sm:$0xff]  }
 0x2e6   :  { %3157 = vmatprep.subr.bf16.mxu0 %v4482_v54 }
 0x2e9   :  { %3158 = vmatpush1.bf16.msra.mxu0 %v4480_v55 }
 0x2ea   :  { %3159 = vmatprep.subr.bf16.mxu0 %v4485_v57 }
 0x2ed   :  { %3160 = vmatpush1.bf16.msra.mxu0 %v4483_v5 }
 0x2ee   :  { %3161 = vmatprep.subr.bf16.mxu0 %v4488_v12 }
 0x2f1   :  { %3162 = vmatpush1.bf16.msra.mxu0 %v4486_v21 }
 0x2f2   :  { %3163 = vmatprep.subr.bf16.mxu0 %v4491_v25 }
 0x2f5   :  { %3164 = vmatpush1.bf16.msra.mxu0 %v4489_v28 }
 0x2f6   :  { %3165 = vmatprep.subr.bf16.mxu0 %v4494_v39 }
 0x2f9   :  { %3166 = vmatpush1.bf16.msra.mxu0 %v4492_v46  ;;  %v4542_v46 = vld [vmem:[%s5886_s8 + $0x8] sm:$0xff]  }
 0x2fa   :  { %3167 = vmatprep.subr.bf16.mxu0 %v4497_v56  ;;  %v4544_v56 = vld [vmem:[%s5886_s8 + $0x18] sm:$0xff]  }
 0x2fd   :  { %3168 = vmatpush1.bf16.msra.mxu0 %v4495_v61 }
 0x2fe   :  { %3169 = vmatprep.subr.bf16.mxu0 %v4500_v63  ;;  %v3861_v63 = vld [vmem:[%s5888_s7] ss:$0 sm:$0xff] }
 0x301   :  { %3170 = vmatpush1.bf16.msra.mxu0 %v4498_v43 }
 0x302   :  { %3171 = vmatprep.subr.bf16.mxu0 %v4503_v59 }
 0x305   :  { %3172 = vmatpush1.bf16.msra.mxu0 %v4501_v0 }
 0x306   :  { %3173 = vmatprep.subr.bf16.mxu0 %v4506_v1 }
 0x309   :  { %3174 = vmatpush1.bf16.msra.mxu0 %v4504_v10  ;;  %v3878_v10 = vld [vmem:[%s5889_s9] ss:$0 sm:$0xff] }
 0x30a   :  { %3175 = vmatprep.subr.bf16.mxu0 %v4509_v19 }
 0x30d   :  { %3176 = vmatpush1.bf16.msra.mxu0 %v4507_v34 }
 0x30e   :  { %3177 = vmatprep.subr.bf16.mxu0 %v4512_v51 }
 0x311   :  { %3178 = vmatpush1.bf16.msra.mxu0 %v4510_v60 }
 0x312   :  { %3179 = vmatprep.subr.bf16.mxu0 %v4515_v11 }
 0x315   :  { %3180 = vmatpush1.bf16.msra.mxu0 %v4513_v36 }
 0x316   :  { %3181 = vmatprep.subr.bf16.mxu0 %v4518_v38 }
 0x319   :  { %3182 = vmatpush1.bf16.msra.mxu0 %v4516_v3 }
 0x31a   :  { %3183 = vmatprep.subr.bf16.mxu0 %v4521_v4 }
 0x31d   :  { %3184 = vmatpush1.bf16.msra.mxu0 %v4519_v7 }
 0x31e   :  { %3185 = vmatprep.subr.bf16.mxu0 %v4524_v9 }
 0x321   :  { %3186 = vmatpush1.bf16.msra.mxu0 %v4522_v13 }
 0x324   :  { %3188 = vmatmul.mubr.bf16.vlgmr.msra.gmra.mrb[20].mxu0 %v1304_v37  ;;  %v4550_v37 = vmov 0.0  }
 0x325   :  { %4006 = vmatprep.subr.bf16.mxu1 %v4550_v37 }
 0x36e   :  { %v2974_v14 = vpop.f32.mrb[28].mxu1 }
 0x36f   :  { %v2976_v16 = vpop.f32.mrb[29].mxu1  ;;  %v4026_v41 = vadd.f32 %v2974_v14, %v1567_v30 }
 0x370   :  { %v2978_v18 = vpop.f32.mrb[30].mxu1  ;;  %v4028_v42 = vadd.f32 %v2976_v16, %v1571_v40 }
 0x371   :  { %v2980_v26 = vpop.f32.mrb[31].mxu1  ;;  %v4030_v45 = vadd.f32 %v2978_v18, %v1567_v30 }
 0x372   :  { %v4032_v52 = vadd.f32 %v2980_v26, %v1571_v40 }
 0x3f7   :  { %v3189_v44 = vpop.f32.mrb[20].mxu0 }
 0x3f8   :  { %v4027_v47 = vadd.f32 %v4026_v41, %v3189_v44  ;;  %v3191_v20 = vpop.f32.mrb[21].mxu0 }
 0x3f9   :  { %v4029_v53 = vadd.f32 %v4028_v42, %v3191_v20  ;;  %v3193_v54 = vpop.f32.mrb[22].mxu0 }
 0x3fa   :  { %v4031_v55 = vadd.f32 %v4030_v45, %v3193_v54  ;;  %v3195_v57 = vpop.f32.mrb[23].mxu0  ;;  %v3198_v12 = vmax.f32 %v4027_v47, 0.0 }
 0x3fb   :  { %v4033_v5 = vadd.f32 %v4032_v52, %v3195_v57  ;;  %v3199_v25 = vmax.f32 %v4029_v53, 0.0 }
 0x3fc   :  { %v3200_v21 = vmax.f32 %v4031_v55, 0.0 }
 0x3fd   :  { %v3201_v28 = vmax.f32 %v4033_v5, 0.0 }
 0x3fe   :  { %v3202_v39 = vpack.c.bf16 %v3200_v21, %v3198_v12 }
 0x3ff   :  { %v3203_v31 = vpack.c.bf16 %v3201_v28, %v3199_v25 }
 0x401   :  { %3371 = vmatprep.mubr.bf16.mxu1 %v3203_v31 }
 0x402   :  { %3372 = vmatmul.mubr.bf16.vlgmr.msra.gmra.mrb[32].mxu1 %v3202_v39 }
 0x403   :  { %4007 = vmatpush3.bf16.msra.mxu1 %v4541_v33  ;;  %4022 = vmatprep.mubr.msk.bf16.mxu1 %vm4551_vm2, %v4550_v37 }
 0x404   :  { %4008 = vmatprep.subr.bf16.mxu1 %v4550_v37 }
 0x407   :  { %4009 = vmatpush3.bf16.msra.mxu1 %v4542_v46 }
 0x408   :  { %4010 = vmatprep.subr.bf16.mxu1 %v4550_v37 }
 0x40b   :  { %4011 = vmatpush3.bf16.msra.mxu1 %v4543_v48 }
 0x40c   :  { %4012 = vmatprep.subr.bf16.mxu1 %v4550_v37 }
 0x40f   :  { %4013 = vmatpush3.bf16.msra.mxu1 %v4544_v56 }
 0x410   :  { %4014 = vmatprep.subr.bf16.mxu1 %v4550_v37 }
 0x413   :  { %4015 = vmatpush3.bf16.msra.mxu1 %v4545_v15 }
 0x414   :  { %4016 = vmatprep.subr.bf16.mxu1 %v4550_v37 }
 0x417   :  { %4017 = vmatpush3.bf16.msra.mxu1 %v4546_v17 }
 0x418   :  { %4018 = vmatprep.subr.bf16.mxu1 %v4550_v37 }
 0x41b   :  { %4019 = vmatpush3.bf16.msra.mxu1 %v4547_v23 }
 0x41c   :  { %4020 = vmatprep.subr.bf16.mxu1 %v4550_v37 }
 0x41f   :  { %4021 = vmatpush3.bf16.msra.mxu1 %v4548_v58 }
 0x4d5   :  { %v3991_v61 = vpop.f32.mrb[32].mxu1 }
 0x4d6   :  { %v3992_v49 = vpop.f32.mrb[33].mxu1 }
 0x4d7   :  { %v3993_v43 = vadd.f32 %v3992_v49, %v3991_v61  ;;  %v3994_v50 = vpop.f32.mrb[34].mxu1 }
 0x4d8   :  { %v3995_v59 = vpop.f32.mrb[35].mxu1 }
 0x4d9   :  { %v3374_v22 = vadd.f32 %v3993_v43, %v3861_v63  ;;  %v3996_v62 = vadd.f32 %v3995_v59, %v3994_v50 }
 0x4db   :  { %v3377_v0 = vadd.f32 %v3996_v62, %v3861_v63  ;;  %v3380_v1 = vmax.f32 %v3374_v22, 0.0 }
 0x4dd   :  { %v3381_v2 = vmax.f32 %v3377_v0, 0.0 }
 0x4df   :  { %v3382_v8 = vpack.c.bf16 %v3381_v2, %v3380_v1 }
 0x4e1   :  { %4023 = vmatmul.mubr.bf16.vlgmr.msra.gmra.mrb[36].mxu1 %v3382_v8 }
 0x5b4   :  { %v3488_v19 = vpop.f32.mrb[36].mxu1 }
 0x5b5   :  { %v3489_v34 = vadd.f32 %v3878_v10, %v3488_v19  ;;  %v4024_v51 = vpop.f32.mrb[37].mxu1 }
 0x5b6   :  { %v3491_v60 = vpop.f32.mrb[38].mxu1 }
 0x5b7   :  { %3495 = vst [vmem:[%s5890_s10] sm:$0xff] %v3489_v34  ;;  %v3492_v11 = vadd.f32 %v3878_v10, %v3491_v60  ;;  %v4025_v36 = vpop.f32.mrb[39].mxu1 }
 0x5b9   :  { %3496 = vst [vmem:[%s5890_s10 + $0x8] sm:$0xff] %v3492_v11 }

</bundles_post_ra>
